<compile_context>
chip_gen: v7x
topology: tpu7x:2x2x1
jax: 0.10.0
libtpu: 0.0.40
codegen_flags: <defaults>
</compile_context>

<pallas_src>
import functools

import jax
import jax.numpy as jnp
from jax.experimental import pallas as pl
from jax.experimental.pallas import tpu as pltpu


def _round_up(x, m):
    return (x + m - 1) // m * m


# ----------------------------------------------------------------------------
# Fused whole-model kernel (one batch element per grid step)
# ----------------------------------------------------------------------------

def model_kernel(x_ref, masks_ref,
                 w_in1_ref, b_in1_ref,
                 w_inr_ref, b_inr_ref,
                 wd_ref, bd_ref, wp_ref, bp_ref,
                 w_out_ref, b_out_ref,
                 out_ref,
                 featpad_ref, stack_ref,
                 *, dilations, Kmax, F, Pm, num_stages):
    """Full MultiFlowMultiStageModel forward for one batch element.

    x      : (1, D, Tp)     model input (time zero-padded to Tp)
    masks  : (1, 2, Tp)     row0 = mask[:,0:1,:], row1 = (t < T) indicator
    w_in1  : (F, D) bf16,   b_in1 : (F, 1) f32          stage-1 input conv
    w_inr  : (max(S-1,1), F, C) bf16, b_inr : (.., F, 1) stages>=2 input convs
    wd     : (S, L, 2F, Kmax*F) bf16  combined dual-flow dilated conv weights
    bd     : (S, L, 2F, 1) f32
    wp     : (S, L, F, 2F) bf16       combined 1x1 convs (0.5 averaging folded in)
    bp     : (S, L, F, 1) f32
    w_out  : (S, C, F) bf16,  b_out : (S, C, 1) f32
    out    : (1, S, C, Tp)
    featpad_ref : (F, Pm + Tp + Pm) f32 VMEM  resident feature with zero halos
    stack_ref   : (Kmax*F, Tp)      f32 VMEM  stacked shifted tap views
    """
    f32, bf16 = jnp.float32, jnp.bfloat16
    Tp = out_ref.shape[3]
    half = (Kmax - 1) // 2

    m = masks_ref[0, 0:1, :]        # (1, Tp)  sample validity mask
    tmask = masks_ref[0, 1:2, :]    # (1, Tp)  1 for real frames, 0 for pad tail

    # zero the halos once; they are never written again for the whole model
    featpad_ref[:, 0:Pm] = jnp.zeros((F, Pm), f32)
    featpad_ref[:, Pm + Tp:Pm + Tp + Pm] = jnp.zeros((F, Pm), f32)

    x_in = x_ref[0].astype(bf16)    # (D, Tp)
    prev = None                     # previous stage's masked logits (C, Tp)

    for s in range(num_stages):                      # static unroll over stages
        if s == 0:
            # stage-1 input 1x1 conv (bf16 operands, f32 accumulate)
            feat = jnp.dot(w_in1_ref[...], x_in,
                           preferred_element_type=f32) + b_in1_ref[...]
        else:
            # fused inter-stage softmax(prev_logits, channel) * mask
            e = jnp.exp(prev - jnp.max(prev, axis=0, keepdims=True))
            inv = pl.reciprocal(jnp.sum(e, axis=0, keepdims=True), approx=True)
            sm = e * inv * m                                          # (C, Tp)
            feat = jnp.dot(w_inr_ref[s - 1], sm.astype(bf16),
                           preferred_element_type=f32) + b_inr_ref[s - 1]
        # zero the padded time tail so dilated taps see zero padding there
        feat = feat * tmask                                           # (F, Tp)

        for l, d in enumerate(dilations):            # static unroll over layers
            featpad_ref[:, Pm:Pm + Tp] = feat        # visible to this layer's taps
            # stacked shifted views -> (Kmax*F, Tp); shared by both flows
            for k in range(Kmax):                    # static unroll over taps
                off = Pm + (k - half) * d            # static lane offset
                stack_ref[k * F:(k + 1) * F, :] = featpad_ref[:, off:off + Tp]

            # dual-flow dilated conv as a single stacked matmul -> (2F, Tp)
            h = jnp.dot(wd_ref[s, l], stack_ref[...].astype(bf16),
                        preferred_element_type=f32) + bd_ref[s, l]
            h = jnp.maximum(h, 0.0)                  # ReLU (both flows)
            # fused 1x1 convs of both flows; 0.5*(out1+out2) comes out directly
            delta = jnp.dot(wp_ref[s, l], h.astype(bf16),
                            preferred_element_type=f32) + bp_ref[s, l]  # (F, Tp)
            # TODO(synk): nn.Dropout() omitted (identity in eval-mode forward).
            feat = (feat + delta) * m                # residual + mask

        # output 1x1 conv + mask
        logits = jnp.dot(w_out_ref[s], feat.astype(bf16),
                         preferred_element_type=f32) + b_out_ref[s]   # (C, Tp)
        prev = logits * m
        out_ref[0, s] = prev.astype(out_ref.dtype)


# ----------------------------------------------------------------------------
# Pallas call wrapper (single call for the whole model)
# ----------------------------------------------------------------------------

_WEIGHT_NAMES = ('w_in1', 'b_in1', 'w_inr', 'b_inr',
                 'wd', 'bd', 'wp', 'bp', 'w_out', 'b_out')


def run_model(x_p, masks, wts, *, dilations, Kmax, F, Pm, num_stages):
    N, D, Tp = x_p.shape
    C = wts['w_out'].shape[1]

    kern = functools.partial(model_kernel, dilations=tuple(dilations),
                             Kmax=Kmax, F=F, Pm=Pm, num_stages=num_stages)

    def _full(a):
        nd = a.ndim
        return pl.BlockSpec(a.shape, lambda n, _nd=nd: (0,) * _nd)

    in_specs = [
        pl.BlockSpec((1, D, Tp), lambda n: (n, 0, 0)),     # model input
        pl.BlockSpec((1, 2, Tp), lambda n: (n, 0, 0)),     # masks
    ] + [_full(wts[k]) for k in _WEIGHT_NAMES]

    # VMEM budget estimate; only raise the scoped limit when buffers get big
    # (v5e default scoped VMEM is 16 MiB; cap well below v7x's 64 MiB physical).
    scratch_bytes = 4 * F * (Tp + 2 * Pm) + 4 * Kmax * F * Tp
    io_bytes = 2 * 4 * (D + 2 + num_stages * C) * Tp
    w_bytes = 2 * sum(int(wts[k].size) * wts[k].dtype.itemsize
                      for k in _WEIGHT_NAMES)
    vmem_est = scratch_bytes + io_bytes + w_bytes
    cp_kwargs = {}
    if vmem_est > 12 * 1024 * 1024:
        cp_kwargs["vmem_limit_bytes"] = int(min(vmem_est * 3 // 2, 48 * 1024 * 1024))

    return pl.pallas_call(
        kern,
        out_shape=jax.ShapeDtypeStruct((N, num_stages, C, Tp), jnp.float32),
        grid=(N,),
        in_specs=in_specs,
        out_specs=pl.BlockSpec((1, num_stages, C, Tp), lambda n: (n, 0, 0, 0)),
        scratch_shapes=[
            pltpu.VMEM((F, Tp + 2 * Pm), jnp.float32),   # resident feature + halo
            pltpu.VMEM((Kmax * F, Tp), jnp.float32),     # stacked shifted taps
        ],
        compiler_params=pltpu.CompilerParams(
            dimension_semantics=("parallel",), **cp_kwargs),
    )(x_p, masks, *[wts[k] for k in _WEIGHT_NAMES])


# ----------------------------------------------------------------------------
# Weight preparation: fuse the two flows' weights; stack all stages
# ----------------------------------------------------------------------------

def _tapmat(w, Kmax):
    """(K, Fout, Fin) tap-major conv weight -> (Fout, Kmax*Fin), taps centered."""
    K, Fo, Fi = w.shape
    pad = (Kmax - K) // 2
    wp = jnp.pad(w, ((pad, pad), (0, 0), (0, 0)))
    return jnp.transpose(wp, (1, 0, 2)).reshape(Fo, Kmax * Fi)


def prepare_params(params, Kmax, num_stages):
    stage_raws = [params['stage1']] + list(params['stages'])
    wd_s, bd_s, wp_s, bp_s, wout_s, bout_s = [], [], [], [], [], []
    for raw in stage_raws:
        wd_l, bd_l, wp_l, bp_l = [], [], [], []
        for lp in raw['layers']:
            wd_l.append(jnp.concatenate([_tapmat(lp['wd1'], Kmax),
                                         _tapmat(lp['wd2'], Kmax)], axis=0))  # (2F, Kmax*F)
            bd_l.append(jnp.concatenate([lp['bd1'], lp['bd2']], axis=0))      # (2F, 1)
            wp_l.append(jnp.concatenate([0.5 * lp['wp1'], 0.5 * lp['wp2']],
                                        axis=1))                              # (F, 2F)
            bp_l.append(0.5 * (lp['bp1'] + lp['bp2']))                        # (F, 1)
        wd_s.append(jnp.stack(wd_l)); bd_s.append(jnp.stack(bd_l))
        wp_s.append(jnp.stack(wp_l)); bp_s.append(jnp.stack(bp_l))
        wout_s.append(raw['w_out']); bout_s.append(raw['b_out'])

    w_in1 = params['stage1']['w_in'].astype(jnp.bfloat16)
    b_in1 = params['stage1']['b_in']
    F = w_in1.shape[0]
    C = wout_s[0].shape[0]
    if num_stages > 1:
        w_inr = jnp.stack([r['w_in'] for r in params['stages']]).astype(jnp.bfloat16)
        b_inr = jnp.stack([r['b_in'] for r in params['stages']])
    else:  # dummy, never read inside the kernel
        w_inr = jnp.zeros((1, F, C), jnp.bfloat16)
        b_inr = jnp.zeros((1, F, 1), jnp.float32)

    return {
        'w_in1': w_in1, 'b_in1': b_in1, 'w_inr': w_inr, 'b_inr': b_inr,
        'wd': jnp.stack(wd_s).astype(jnp.bfloat16), 'bd': jnp.stack(bd_s),
        'wp': jnp.stack(wp_s).astype(jnp.bfloat16), 'bp': jnp.stack(bp_s),
        'w_out': jnp.stack(wout_s).astype(jnp.bfloat16), 'b_out': jnp.stack(bout_s),
    }


# ----------------------------------------------------------------------------
# Model forward (orchestration in plain JAX, all compute in the fused kernel)
# ----------------------------------------------------------------------------

def model_forward(x, mask, params, *, K1, K2, sample_rate, dilations):
    assert K1 % 2 == 1 and K2 % 2 == 1, "odd kernel sizes expected for 'same' conv"
    N, _, T = x.shape
    F = params['stage1']['w_in'].shape[0]
    num_stages = 1 + len(params['stages'])
    Kmax = max(K1, K2)
    Tp = _round_up(T, 128)                                      # lane-dense time
    Pm = _round_up(max(((Kmax - 1) * d) // 2 for d in dilations), 128)  # aligned halo

    # pad inputs/masks along time once (zeros); mask keeps the tail inert
    x_p = jnp.pad(x, ((0, 0), (0, 0), (0, Tp - T)))
    mask_ds = mask[:, :, ::sample_rate]                         # mask[:, :, ::sr]
    m1 = mask_ds[:, 0:1, :].astype(jnp.float32)                 # (N, 1, T)
    m1_p = jnp.pad(m1, ((0, 0), (0, 0), (0, Tp - T)))
    tmask = jnp.concatenate([jnp.ones((N, 1, T), jnp.float32),
                             jnp.zeros((N, 1, Tp - T), jnp.float32)], axis=2)
    masks = jnp.concatenate([m1_p, tmask], axis=1)              # (N, 2, Tp)

    wts = prepare_params(params, Kmax, num_stages)
    out = run_model(x_p, masks, wts, dilations=tuple(dilations), Kmax=Kmax,
                    F=F, Pm=Pm, num_stages=num_stages)          # (N, S, C, Tp)

    outputs = jnp.transpose(out, (1, 0, 2, 3))[:, :, :, :T]     # (S, N, C, T)
    # F.interpolate(nearest, scale_factor=[1, sample_rate]) == repeat along T
    outputs = jnp.repeat(outputs, sample_rate, axis=-1)
    return {'output': outputs}


# ----------------------------------------------------------------------------
# Parameter init (deterministic, synthetic; tap-major conv weights)
# ----------------------------------------------------------------------------

def init_params(key, K1, K2, num_stages, num_layers, F, D, C):
    def stage_params(k, din):
        keys = jax.random.split(k, 4 + num_layers)
        p = {
            'w_in': 0.2 * jax.random.normal(keys[0], (F, din), jnp.float32),
            'b_in': 0.1 * jax.random.normal(keys[1], (F, 1), jnp.float32),
            'w_out': 0.2 * jax.random.normal(keys[2], (C, F), jnp.float32),
            'b_out': 0.1 * jax.random.normal(keys[3], (C, 1), jnp.float32),
            'layers': [],
        }
        for i in range(num_layers):
            lk = jax.random.split(keys[4 + i], 8)
            p['layers'].append(dict(
                wd1=0.2 * jax.random.normal(lk[0], (K1, F, F), jnp.float32),
                bd1=0.1 * jax.random.normal(lk[1], (F, 1), jnp.float32),
                wp1=0.2 * jax.random.normal(lk[2], (F, F), jnp.float32),
                bp1=0.1 * jax.random.normal(lk[3], (F, 1), jnp.float32),
                wd2=0.2 * jax.random.normal(lk[4], (K2, F, F), jnp.float32),
                bd2=0.1 * jax.random.normal(lk[5], (F, 1), jnp.float32),
                wp2=0.2 * jax.random.normal(lk[6], (F, F), jnp.float32),
                bp2=0.1 * jax.random.normal(lk[7], (F, 1), jnp.float32),
            ))
        return p

    ks = jax.random.split(key, num_stages)
    return {
        'stage1': stage_params(ks[0], D),
        'stages': [stage_params(ks[s], C) for s in range(1, num_stages)],
    }


# ----------------------------------------------------------------------------
# Pure-JAX reference (mirrors the module; matmul operands cast to bf16 to
# match the kernel's MXU precision, accumulation in f32)
# ----------------------------------------------------------------------------

def _bf(a):
    return a.astype(jnp.bfloat16)


def _ref_drl(x, m1, wd, bd, wp, bp, d):
    N, _, T = x.shape
    K = wd.shape[0]
    P = ((K - 1) * d) // 2
    xp = jnp.pad(x, ((0, 0), (0, 0), (P, P)))
    acc = jnp.zeros((N, wd.shape[1], T), jnp.float32) + bd[None]
    for k in range(K):
        acc = acc + jnp.einsum('oc,nct->not', _bf(wd[k]),
                               _bf(xp[:, :, k * d:k * d + T]),
                               preferred_element_type=jnp.float32)
    h = jax.nn.relu(acc)
    out = jnp.einsum('oc,nct->not', _bf(wp), _bf(h),
                     preferred_element_type=jnp.float32) + bp[None]
    return (x + out) * m1


def _ref_stage(x, m1, p, dilations):
    feat = jnp.einsum('oc,nct->not', _bf(p['w_in']), _bf(x),
                      preferred_element_type=jnp.float32) + p['b_in'][None]
    for lp, d in zip(p['layers'], dilations):
        f1 = _ref_drl(feat, m1, lp['wd1'], lp['bd1'], lp['wp1'], lp['bp1'], d)
        f2 = _ref_drl(feat, m1, lp['wd2'], lp['bd2'], lp['wp2'], lp['bp2'], d)
        feat = 0.5 * f1 + 0.5 * f2
    out = jnp.einsum('oc,nct->not', _bf(p['w_out']), _bf(feat),
                     preferred_element_type=jnp.float32) + p['b_out'][None]
    return out * m1


def ref_forward(x, mask, params, sample_rate, dilations):
    mds = mask[:, :, ::sample_rate]
    m1 = mds[:, 0:1, :]
    out = _ref_stage(x, m1, params['stage1'], dilations)
    outs = [out]
    for sp in params['stages']:
        nxt = jax.nn.softmax(out, axis=1) * m1
        out = _ref_stage(nxt, m1, sp, dilations)
        outs.append(out)
    return jnp.repeat(jnp.stack(outs, 0), sample_rate, axis=-1)


# ----------------------------------------------------------------------------
# Main
# ----------------------------------------------------------------------------

if __name__ == "__main__":
    # Small config consistent with the module's constructor.
    K1, K2 = 3, 5
    num_stages, num_layers = 2, 3
    num_f_maps, dim, num_classes = 8, 4, 6
    sample_rate = 2
    N, T_full = 2, 32
    T = T_full // sample_rate

    dilations = [2 ** i if i <= 5 else 2 ** 5 + i * 10 for i in range(num_layers)]

    key = jax.random.PRNGKey(0)
    kx, kp = jax.random.split(key)
    x = jax.random.normal(kx, (N, dim, T), jnp.float32)

    # Binary validity mask, shape (N, num_classes, T_full).
    lengths = jnp.array([T_full, 24])
    t_idx = jnp.arange(T_full)
    mask = (t_idx[None, None, :] < lengths[:, None, None]).astype(jnp.float32)
    mask = jnp.broadcast_to(mask, (N, num_classes, T_full))

    params = init_params(kp, K1, K2, num_stages, num_layers,
                         num_f_maps, dim, num_classes)

    fwd = jax.jit(functools.partial(
        model_forward, K1=K1, K2=K2, sample_rate=sample_rate,
        dilations=tuple(dilations)))

    result = jax.block_until_ready(fwd(x, mask, params))
    out = result['output']
    assert out.shape == (num_stages, N, num_classes, T_full), out.shape

    ref = ref_forward(x, mask, params, sample_rate, dilations)
    # bf16 MXU operands + approx-reciprocal softmax -> relaxed tolerance vs ref
    err = float(jnp.max(jnp.abs(out - ref)))
    assert err < 2e-2, err

    print("KERNEL_OK")
</pallas_src>

<mosaic_0001>
module attributes {stable_mosaic.version = 11 : i64} {
  func.func @model_kernel(%arg0: i32, %arg1: memref<1x4x128xf32, #tpu.memory_space<vmem>>, %arg2: memref<1x2x128xf32, #tpu.memory_space<vmem>>, %arg3: memref<8x4xbf16, #tpu.memory_space<vmem>>, %arg4: memref<8x1xf32, #tpu.memory_space<vmem>>, %arg5: memref<1x8x6xbf16, #tpu.memory_space<vmem>>, %arg6: memref<1x8x1xf32, #tpu.memory_space<vmem>>, %arg7: memref<2x3x16x40xbf16, #tpu.memory_space<vmem>>, %arg8: memref<2x3x16x1xf32, #tpu.memory_space<vmem>>, %arg9: memref<2x3x8x16xbf16, #tpu.memory_space<vmem>>, %arg10: memref<2x3x8x1xf32, #tpu.memory_space<vmem>>, %arg11: memref<2x6x8xbf16, #tpu.memory_space<vmem>>, %arg12: memref<2x6x1xf32, #tpu.memory_space<vmem>>, %arg13: memref<1x2x6x128xf32, #tpu.memory_space<vmem>>, %arg14: memref<8x384xf32, #tpu.memory_space<vmem>>, %arg15: memref<40x128xf32, #tpu.memory_space<vmem>>) attributes {dimension_semantics = [#tpu.dimension_semantics<parallel>], iteration_bounds = array<i64: 2>, scalar_prefetch = 0 : i64, scratch_operands = 2 : i64, tpu.core_type = #tpu.core_type<tc>, window_params = [{transform_indices = @transform_0, window_bounds = array<i64: 1, 4, 128>}, {transform_indices = @transform_1, window_bounds = array<i64: 1, 2, 128>}, {pipeline_mode = #tpu.pipeline_mode<synchronous>, transform_indices = @transform_2, window_bounds = array<i64: 8, 4>}, {pipeline_mode = #tpu.pipeline_mode<synchronous>, transform_indices = @transform_3, window_bounds = array<i64: 8, 1>}, {pipeline_mode = #tpu.pipeline_mode<synchronous>, transform_indices = @transform_4, window_bounds = array<i64: 1, 8, 6>}, {pipeline_mode = #tpu.pipeline_mode<synchronous>, transform_indices = @transform_5, window_bounds = array<i64: 1, 8, 1>}, {pipeline_mode = #tpu.pipeline_mode<synchronous>, transform_indices = @transform_6, window_bounds = array<i64: 2, 3, 16, 40>}, {pipeline_mode = #tpu.pipeline_mode<synchronous>, transform_indices = @transform_7, window_bounds = array<i64: 2, 3, 16, 1>}, {pipeline_mode = #tpu.pipeline_mode<synchronous>, transform_indices = @transform_8, window_bounds = array<i64: 2, 3, 8, 16>}, {pipeline_mode = #tpu.pipeline_mode<synchronous>, transform_indices = @transform_9, window_bounds = array<i64: 2, 3, 8, 1>}, {pipeline_mode = #tpu.pipeline_mode<synchronous>, transform_indices = @transform_10, window_bounds = array<i64: 2, 6, 8>}, {pipeline_mode = #tpu.pipeline_mode<synchronous>, transform_indices = @transform_11, window_bounds = array<i64: 2, 6, 1>}, {transform_indices = @transform_12, window_bounds = array<i64: 1, 2, 6, 128>}]} {
    %c0 = arith.constant 0 : index
    %c0_0 = arith.constant 0 : index
    %c0_1 = arith.constant 0 : index
    %0 = vector.load %arg2[%c0, %c0_0, %c0_1] : memref<1x2x128xf32, #tpu.memory_space<vmem>>, vector<1x1x128xf32>
    %1 = vector.shape_cast %0 : vector<1x1x128xf32> to vector<1x128xf32>
    %c0_2 = arith.constant 0 : index
    %c1 = arith.constant 1 : index
    %c0_3 = arith.constant 0 : index
    %2 = vector.load %arg2[%c0_2, %c1, %c0_3] : memref<1x2x128xf32, #tpu.memory_space<vmem>>, vector<1x1x128xf32>
    %3 = vector.shape_cast %2 : vector<1x1x128xf32> to vector<1x128xf32>
    %cst = arith.constant 0.000000e+00 : f32
    %4 = vector.broadcast %cst : f32 to vector<8x128xf32>
    %c0_4 = arith.constant 0 : index
    %c0_5 = arith.constant 0 : index
    %5 = vector.load %arg14[%c0_4, %c0_5] : memref<8x384xf32, #tpu.memory_space<vmem>>, vector<8x128xf32>
    tpu.vector_store %arg14[%c0_4, %c0_5], %4 {strides = array<i32>} : memref<8x384xf32, #tpu.memory_space<vmem>>, vector<8x128xf32>,
    %cst_6 = arith.constant 0.000000e+00 : f32
    %6 = vector.broadcast %cst_6 : f32 to vector<8x128xf32>
    %c0_7 = arith.constant 0 : index
    %c256 = arith.constant 256 : index
    %7 = vector.load %arg14[%c0_7, %c256] : memref<8x384xf32, #tpu.memory_space<vmem>>, vector<8x128xf32>
    tpu.vector_store %arg14[%c0_7, %c256], %6 {strides = array<i32>} : memref<8x384xf32, #tpu.memory_space<vmem>>, vector<8x128xf32>,
    %c0_8 = arith.constant 0 : index
    %c0_9 = arith.constant 0 : index
    %c0_10 = arith.constant 0 : index
    %8 = vector.load %arg1[%c0_8, %c0_9, %c0_10] : memref<1x4x128xf32, #tpu.memory_space<vmem>>, vector<1x4x128xf32>
    %9 = vector.shape_cast %8 : vector<1x4x128xf32> to vector<4x128xf32>
    %10 = arith.truncf %9 : vector<4x128xf32> to vector<4x128xbf16>
    %c0_11 = arith.constant 0 : index
    %c0_12 = arith.constant 0 : index
    %11 = vector.load %arg3[%c0_11, %c0_12] : memref<8x4xbf16, #tpu.memory_space<vmem>>, vector<8x4xbf16>
    %cst_13 = arith.constant dense<0.000000e+00> : vector<8x128xf32>
    %12 = tpu.matmul %11, %10, %cst_13 {dimension_numbers = #tpu.dot_dimension_numbers<[1], [0], [0], [1], [0, 0, 1, 1], [], []>} : vector<8x4xbf16>, vector<4x128xbf16>, vector<8x128xf32> -> vector<8x128xf32>
    %c0_14 = arith.constant 0 : index
    %c0_15 = arith.constant 0 : index
    %13 = vector.load %arg4[%c0_14, %c0_15] : memref<8x1xf32, #tpu.memory_space<vmem>>, vector<8x1xf32>
    %14 = vector.broadcast %13 : vector<8x1xf32> to vector<8x128xf32>
    %15 = arith.addf %12, %14 : vector<8x128xf32>
    %16 = vector.broadcast %3 : vector<1x128xf32> to vector<8x128xf32>
    %17 = arith.mulf %15, %16 : vector<8x128xf32>
    %c0_16 = arith.constant 0 : index
    %c128 = arith.constant 128 : index
    %18 = vector.load %arg14[%c0_16, %c128] : memref<8x384xf32, #tpu.memory_space<vmem>>, vector<8x128xf32>
    tpu.vector_store %arg14[%c0_16, %c128], %17 {strides = array<i32>} : memref<8x384xf32, #tpu.memory_space<vmem>>, vector<8x128xf32>,
    %c0_17 = arith.constant 0 : index
    %c126 = arith.constant 126 : index
    %19 = vector.load %arg14[%c0_17, %c126] : memref<8x384xf32, #tpu.memory_space<vmem>>, vector<8x128xf32>
    %c0_18 = arith.constant 0 : index
    %c0_19 = arith.constant 0 : index
    %20 = vector.load %arg15[%c0_18, %c0_19] : memref<40x128xf32, #tpu.memory_space<vmem>>, vector<8x128xf32>
    tpu.vector_store %arg15[%c0_18, %c0_19], %19 {strides = array<i32>} : memref<40x128xf32, #tpu.memory_space<vmem>>, vector<8x128xf32>,
    %c0_20 = arith.constant 0 : index
    %c127 = arith.constant 127 : index
    %21 = vector.load %arg14[%c0_20, %c127] : memref<8x384xf32, #tpu.memory_space<vmem>>, vector<8x128xf32>
    %c8 = arith.constant 8 : index
    %c0_21 = arith.constant 0 : index
    %22 = vector.load %arg15[%c8, %c0_21] : memref<40x128xf32, #tpu.memory_space<vmem>>, vector<8x128xf32>
    tpu.vector_store %arg15[%c8, %c0_21], %21 {strides = array<i32>} : memref<40x128xf32, #tpu.memory_space<vmem>>, vector<8x128xf32>,
    %c0_22 = arith.constant 0 : index
    %c128_23 = arith.constant 128 : index
    %23 = vector.load %arg14[%c0_22, %c128_23] : memref<8x384xf32, #tpu.memory_space<vmem>>, vector<8x128xf32>
    %c16 = arith.constant 16 : index
    %c0_24 = arith.constant 0 : index
    %24 = vector.load %arg15[%c16, %c0_24] : memref<40x128xf32, #tpu.memory_space<vmem>>, vector<8x128xf32>
    tpu.vector_store %arg15[%c16, %c0_24], %23 {strides = array<i32>} : memref<40x128xf32, #tpu.memory_space<vmem>>, vector<8x128xf32>,
    %c0_25 = arith.constant 0 : index
    %c129 = arith.constant 129 : index
    %25 = vector.load %arg14[%c0_25, %c129] : memref<8x384xf32, #tpu.memory_space<vmem>>, vector<8x128xf32>
    %c24 = arith.constant 24 : index
    %c0_26 = arith.constant 0 : index
    %26 = vector.load %arg15[%c24, %c0_26] : memref<40x128xf32, #tpu.memory_space<vmem>>, vector<8x128xf32>
    tpu.vector_store %arg15[%c24, %c0_26], %25 {strides = array<i32>} : memref<40x128xf32, #tpu.memory_space<vmem>>, vector<8x128xf32>,
    %c0_27 = arith.constant 0 : index
    %c130 = arith.constant 130 : index
    %27 = vector.load %arg14[%c0_27, %c130] : memref<8x384xf32, #tpu.memory_space<vmem>>, vector<8x128xf32>
    %c32 = arith.constant 32 : index
    %c0_28 = arith.constant 0 : index
    %28 = vector.load %arg15[%c32, %c0_28] : memref<40x128xf32, #tpu.memory_space<vmem>>, vector<8x128xf32>
    tpu.vector_store %arg15[%c32, %c0_28], %27 {strides = array<i32>} : memref<40x128xf32, #tpu.memory_space<vmem>>, vector<8x128xf32>,
    %c0_29 = arith.constant 0 : index
    %c0_30 = arith.constant 0 : index
    %c0_31 = arith.constant 0 : index
    %c0_32 = arith.constant 0 : index
    %29 = vector.load %arg7[%c0_29, %c0_30, %c0_31, %c0_32] : memref<2x3x16x40xbf16, #tpu.memory_space<vmem>>, vector<1x1x16x40xbf16>
    %30 = vector.shape_cast %29 : vector<1x1x16x40xbf16> to vector<16x40xbf16>
    %c0_33 = arith.constant 0 : index
    %c0_34 = arith.constant 0 : index
    %31 = vector.load %arg15[%c0_33, %c0_34] : memref<40x128xf32, #tpu.memory_space<vmem>>, vector<40x128xf32>
    %32 = arith.truncf %31 : vector<40x128xf32> to vector<40x128xbf16>
    %cst_35 = arith.constant dense<0.000000e+00> : vector<16x128xf32>
    %33 = tpu.matmul %30, %32, %cst_35 {dimension_numbers = #tpu.dot_dimension_numbers<[1], [0], [0], [1], [0, 0, 1, 1], [], []>} : vector<16x40xbf16>, vector<40x128xbf16>, vector<16x128xf32> -> vector<16x128xf32>
    %c0_36 = arith.constant 0 : index
    %c0_37 = arith.constant 0 : index
    %c0_38 = arith.constant 0 : index
    %c0_39 = arith.constant 0 : index
    %34 = vector.load %arg8[%c0_36, %c0_37, %c0_38, %c0_39] : memref<2x3x16x1xf32, #tpu.memory_space<vmem>>, vector<1x1x16x1xf32>
    %35 = vector.shape_cast %34 : vector<1x1x16x1xf32> to vector<16x1xf32>
    %36 = vector.broadcast %35 : vector<16x1xf32> to vector<16x128xf32>
    %37 = arith.addf %33, %36 : vector<16x128xf32>
    %cst_40 = arith.constant 0.000000e+00 : f32
    %38 = vector.broadcast %cst_40 : f32 to vector<16x128xf32>
    %39 = arith.maximumf %37, %38 : vector<16x128xf32>
    %c0_41 = arith.constant 0 : index
    %c0_42 = arith.constant 0 : index
    %c0_43 = arith.constant 0 : index
    %c0_44 = arith.constant 0 : index
    %40 = vector.load %arg9[%c0_41, %c0_42, %c0_43, %c0_44] : memref<2x3x8x16xbf16, #tpu.memory_space<vmem>>, vector<1x1x8x16xbf16>
    %41 = vector.shape_cast %40 : vector<1x1x8x16xbf16> to vector<8x16xbf16>
    %42 = arith.truncf %39 : vector<16x128xf32> to vector<16x128xbf16>
    %cst_45 = arith.constant dense<0.000000e+00> : vector<8x128xf32>
    %43 = tpu.matmul %41, %42, %cst_45 {dimension_numbers = #tpu.dot_dimension_numbers<[1], [0], [0], [1], [0, 0, 1, 1], [], []>} : vector<8x16xbf16>, vector<16x128xbf16>, vector<8x128xf32> -> vector<8x128xf32>
    %c0_46 = arith.constant 0 : index
    %c0_47 = arith.constant 0 : index
    %c0_48 = arith.constant 0 : index
    %c0_49 = arith.constant 0 : index
    %44 = vector.load %arg10[%c0_46, %c0_47, %c0_48, %c0_49] : memref<2x3x8x1xf32, #tpu.memory_space<vmem>>, vector<1x1x8x1xf32>
    %45 = vector.shape_cast %44 : vector<1x1x8x1xf32> to vector<8x1xf32>
    %46 = vector.broadcast %45 : vector<8x1xf32> to vector<8x128xf32>
    %47 = arith.addf %43, %46 : vector<8x128xf32>
    %48 = arith.addf %17, %47 : vector<8x128xf32>
    %49 = vector.broadcast %1 : vector<1x128xf32> to vector<8x128xf32>
    %50 = arith.mulf %48, %49 : vector<8x128xf32>
    %c0_50 = arith.constant 0 : index
    %c128_51 = arith.constant 128 : index
    %51 = vector.load %arg14[%c0_50, %c128_51] : memref<8x384xf32, #tpu.memory_space<vmem>>, vector<8x128xf32>
    tpu.vector_store %arg14[%c0_50, %c128_51], %50 {strides = array<i32>} : memref<8x384xf32, #tpu.memory_space<vmem>>, vector<8x128xf32>,
    %c0_52 = arith.constant 0 : index
    %c124 = arith.constant 124 : index
    %52 = vector.load %arg14[%c0_52, %c124] : memref<8x384xf32, #tpu.memory_space<vmem>>, vector<8x128xf32>
    %c0_53 = arith.constant 0 : index
    %c0_54 = arith.constant 0 : index
    %53 = vector.load %arg15[%c0_53, %c0_54] : memref<40x128xf32, #tpu.memory_space<vmem>>, vector<8x128xf32>
    tpu.vector_store %arg15[%c0_53, %c0_54], %52 {strides = array<i32>} : memref<40x128xf32, #tpu.memory_space<vmem>>, vector<8x128xf32>,
    %c0_55 = arith.constant 0 : index
    %c126_56 = arith.constant 126 : index
    %54 = vector.load %arg14[%c0_55, %c126_56] : memref<8x384xf32, #tpu.memory_space<vmem>>, vector<8x128xf32>
    %c8_57 = arith.constant 8 : index
    %c0_58 = arith.constant 0 : index
    %55 = vector.load %arg15[%c8_57, %c0_58] : memref<40x128xf32, #tpu.memory_space<vmem>>, vector<8x128xf32>
    tpu.vector_store %arg15[%c8_57, %c0_58], %54 {strides = array<i32>} : memref<40x128xf32, #tpu.memory_space<vmem>>, vector<8x128xf32>,
    %c0_59 = arith.constant 0 : index
    %c128_60 = arith.constant 128 : index
    %56 = vector.load %arg14[%c0_59, %c128_60] : memref<8x384xf32, #tpu.memory_space<vmem>>, vector<8x128xf32>
    %c16_61 = arith.constant 16 : index
    %c0_62 = arith.constant 0 : index
    %57 = vector.load %arg15[%c16_61, %c0_62] : memref<40x128xf32, #tpu.memory_space<vmem>>, vector<8x128xf32>
    tpu.vector_store %arg15[%c16_61, %c0_62], %56 {strides = array<i32>} : memref<40x128xf32, #tpu.memory_space<vmem>>, vector<8x128xf32>,
    %c0_63 = arith.constant 0 : index
    %c130_64 = arith.constant 130 : index
    %58 = vector.load %arg14[%c0_63, %c130_64] : memref<8x384xf32, #tpu.memory_space<vmem>>, vector<8x128xf32>
    %c24_65 = arith.constant 24 : index
    %c0_66 = arith.constant 0 : index
    %59 = vector.load %arg15[%c24_65, %c0_66] : memref<40x128xf32, #tpu.memory_space<vmem>>, vector<8x128xf32>
    tpu.vector_store %arg15[%c24_65, %c0_66], %58 {strides = array<i32>} : memref<40x128xf32, #tpu.memory_space<vmem>>, vector<8x128xf32>,
    %c0_67 = arith.constant 0 : index
    %c132 = arith.constant 132 : index
    %60 = vector.load %arg14[%c0_67, %c132] : memref<8x384xf32, #tpu.memory_space<vmem>>, vector<8x128xf32>
    %c32_68 = arith.constant 32 : index
    %c0_69 = arith.constant 0 : index
    %61 = vector.load %arg15[%c32_68, %c0_69] : memref<40x128xf32, #tpu.memory_space<vmem>>, vector<8x128xf32>
    tpu.vector_store %arg15[%c32_68, %c0_69], %60 {strides = array<i32>} : memref<40x128xf32, #tpu.memory_space<vmem>>, vector<8x128xf32>,
    %c0_70 = arith.constant 0 : index
    %c1_71 = arith.constant 1 : index
    %c0_72 = arith.constant 0 : index
    %c0_73 = arith.constant 0 : index
    %62 = vector.load %arg7[%c0_70, %c1_71, %c0_72, %c0_73] : memref<2x3x16x40xbf16, #tpu.memory_space<vmem>>, vector<1x1x16x40xbf16>
    %63 = vector.shape_cast %62 : vector<1x1x16x40xbf16> to vector<16x40xbf16>
    %c0_74 = arith.constant 0 : index
    %c0_75 = arith.constant 0 : index
    %64 = vector.load %arg15[%c0_74, %c0_75] : memref<40x128xf32, #tpu.memory_space<vmem>>, vector<40x128xf32>
    %65 = arith.truncf %64 : vector<40x128xf32> to vector<40x128xbf16>
    %cst_76 = arith.constant dense<0.000000e+00> : vector<16x128xf32>
    %66 = tpu.matmul %63, %65, %cst_76 {dimension_numbers = #tpu.dot_dimension_numbers<[1], [0], [0], [1], [0, 0, 1, 1], [], []>} : vector<16x40xbf16>, vector<40x128xbf16>, vector<16x128xf32> -> vector<16x128xf32>
    %c0_77 = arith.constant 0 : index
    %c1_78 = arith.constant 1 : index
    %c0_79 = arith.constant 0 : index
    %c0_80 = arith.constant 0 : index
    %67 = vector.load %arg8[%c0_77, %c1_78, %c0_79, %c0_80] : memref<2x3x16x1xf32, #tpu.memory_space<vmem>>, vector<1x1x16x1xf32>
    %68 = vector.shape_cast %67 : vector<1x1x16x1xf32> to vector<16x1xf32>
    %69 = vector.broadcast %68 : vector<16x1xf32> to vector<16x128xf32>
    %70 = arith.addf %66, %69 : vector<16x128xf32>
    %cst_81 = arith.constant 0.000000e+00 : f32
    %71 = vector.broadcast %cst_81 : f32 to vector<16x128xf32>
    %72 = arith.maximumf %70, %71 : vector<16x128xf32>
    %c0_82 = arith.constant 0 : index
    %c1_83 = arith.constant 1 : index
    %c0_84 = arith.constant 0 : index
    %c0_85 = arith.constant 0 : index
    %73 = vector.load %arg9[%c0_82, %c1_83, %c0_84, %c0_85] : memref<2x3x8x16xbf16, #tpu.memory_space<vmem>>, vector<1x1x8x16xbf16>
    %74 = vector.shape_cast %73 : vector<1x1x8x16xbf16> to vector<8x16xbf16>
    %75 = arith.truncf %72 : vector<16x128xf32> to vector<16x128xbf16>
    %cst_86 = arith.constant dense<0.000000e+00> : vector<8x128xf32>
    %76 = tpu.matmul %74, %75, %cst_86 {dimension_numbers = #tpu.dot_dimension_numbers<[1], [0], [0], [1], [0, 0, 1, 1], [], []>} : vector<8x16xbf16>, vector<16x128xbf16>, vector<8x128xf32> -> vector<8x128xf32>
    %c0_87 = arith.constant 0 : index
    %c1_88 = arith.constant 1 : index
    %c0_89 = arith.constant 0 : index
    %c0_90 = arith.constant 0 : index
    %77 = vector.load %arg10[%c0_87, %c1_88, %c0_89, %c0_90] : memref<2x3x8x1xf32, #tpu.memory_space<vmem>>, vector<1x1x8x1xf32>
    %78 = vector.shape_cast %77 : vector<1x1x8x1xf32> to vector<8x1xf32>
    %79 = vector.broadcast %78 : vector<8x1xf32> to vector<8x128xf32>
    %80 = arith.addf %76, %79 : vector<8x128xf32>
    %81 = arith.addf %50, %80 : vector<8x128xf32>
    %82 = vector.broadcast %1 : vector<1x128xf32> to vector<8x128xf32>
    %83 = arith.mulf %81, %82 : vector<8x128xf32>
    %c0_91 = arith.constant 0 : index
    %c128_92 = arith.constant 128 : index
    %84 = vector.load %arg14[%c0_91, %c128_92] : memref<8x384xf32, #tpu.memory_space<vmem>>, vector<8x128xf32>
    tpu.vector_store %arg14[%c0_91, %c128_92], %83 {strides = array<i32>} : memref<8x384xf32, #tpu.memory_space<vmem>>, vector<8x128xf32>,
    %c0_93 = arith.constant 0 : index
    %c120 = arith.constant 120 : index
    %85 = vector.load %arg14[%c0_93, %c120] : memref<8x384xf32, #tpu.memory_space<vmem>>, vector<8x128xf32>
    %c0_94 = arith.constant 0 : index
    %c0_95 = arith.constant 0 : index
    %86 = vector.load %arg15[%c0_94, %c0_95] : memref<40x128xf32, #tpu.memory_space<vmem>>, vector<8x128xf32>
    tpu.vector_store %arg15[%c0_94, %c0_95], %85 {strides = array<i32>} : memref<40x128xf32, #tpu.memory_space<vmem>>, vector<8x128xf32>,
    %c0_96 = arith.constant 0 : index
    %c124_97 = arith.constant 124 : index
    %87 = vector.load %arg14[%c0_96, %c124_97] : memref<8x384xf32, #tpu.memory_space<vmem>>, vector<8x128xf32>
    %c8_98 = arith.constant 8 : index
    %c0_99 = arith.constant 0 : index
    %88 = vector.load %arg15[%c8_98, %c0_99] : memref<40x128xf32, #tpu.memory_space<vmem>>, vector<8x128xf32>
    tpu.vector_store %arg15[%c8_98, %c0_99], %87 {strides = array<i32>} : memref<40x128xf32, #tpu.memory_space<vmem>>, vector<8x128xf32>,
    %c0_100 = arith.constant 0 : index
    %c128_101 = arith.constant 128 : index
    %89 = vector.load %arg14[%c0_100, %c128_101] : memref<8x384xf32, #tpu.memory_space<vmem>>, vector<8x128xf32>
    %c16_102 = arith.constant 16 : index
    %c0_103 = arith.constant 0 : index
    %90 = vector.load %arg15[%c16_102, %c0_103] : memref<40x128xf32, #tpu.memory_space<vmem>>, vector<8x128xf32>
    tpu.vector_store %arg15[%c16_102, %c0_103], %89 {strides = array<i32>} : memref<40x128xf32, #tpu.memory_space<vmem>>, vector<8x128xf32>,
    %c0_104 = arith.constant 0 : index
    %c132_105 = arith.constant 132 : index
    %91 = vector.load %arg14[%c0_104, %c132_105] : memref<8x384xf32, #tpu.memory_space<vmem>>, vector<8x128xf32>
    %c24_106 = arith.constant 24 : index
    %c0_107 = arith.constant 0 : index
    %92 = vector.load %arg15[%c24_106, %c0_107] : memref<40x128xf32, #tpu.memory_space<vmem>>, vector<8x128xf32>
    tpu.vector_store %arg15[%c24_106, %c0_107], %91 {strides = array<i32>} : memref<40x128xf32, #tpu.memory_space<vmem>>, vector<8x128xf32>,
    %c0_108 = arith.constant 0 : index
    %c136 = arith.constant 136 : index
    %93 = vector.load %arg14[%c0_108, %c136] : memref<8x384xf32, #tpu.memory_space<vmem>>, vector<8x128xf32>
    %c32_109 = arith.constant 32 : index
    %c0_110 = arith.constant 0 : index
    %94 = vector.load %arg15[%c32_109, %c0_110] : memref<40x128xf32, #tpu.memory_space<vmem>>, vector<8x128xf32>
    tpu.vector_store %arg15[%c32_109, %c0_110], %93 {strides = array<i32>} : memref<40x128xf32, #tpu.memory_space<vmem>>, vector<8x128xf32>,
    %c0_111 = arith.constant 0 : index
    %c2 = arith.constant 2 : index
    %c0_112 = arith.constant 0 : index
    %c0_113 = arith.constant 0 : index
    %95 = vector.load %arg7[%c0_111, %c2, %c0_112, %c0_113] : memref<2x3x16x40xbf16, #tpu.memory_space<vmem>>, vector<1x1x16x40xbf16>
    %96 = vector.shape_cast %95 : vector<1x1x16x40xbf16> to vector<16x40xbf16>
    %c0_114 = arith.constant 0 : index
    %c0_115 = arith.constant 0 : index
    %97 = vector.load %arg15[%c0_114, %c0_115] : memref<40x128xf32, #tpu.memory_space<vmem>>, vector<40x128xf32>
    %98 = arith.truncf %97 : vector<40x128xf32> to vector<40x128xbf16>
    %cst_116 = arith.constant dense<0.000000e+00> : vector<16x128xf32>
    %99 = tpu.matmul %96, %98, %cst_116 {dimension_numbers = #tpu.dot_dimension_numbers<[1], [0], [0], [1], [0, 0, 1, 1], [], []>} : vector<16x40xbf16>, vector<40x128xbf16>, vector<16x128xf32> -> vector<16x128xf32>
    %c0_117 = arith.constant 0 : index
    %c2_118 = arith.constant 2 : index
    %c0_119 = arith.constant 0 : index
    %c0_120 = arith.constant 0 : index
    %100 = vector.load %arg8[%c0_117, %c2_118, %c0_119, %c0_120] : memref<2x3x16x1xf32, #tpu.memory_space<vmem>>, vector<1x1x16x1xf32>
    %101 = vector.shape_cast %100 : vector<1x1x16x1xf32> to vector<16x1xf32>
    %102 = vector.broadcast %101 : vector<16x1xf32> to vector<16x128xf32>
    %103 = arith.addf %99, %102 : vector<16x128xf32>
    %cst_121 = arith.constant 0.000000e+00 : f32
    %104 = vector.broadcast %cst_121 : f32 to vector<16x128xf32>
    %105 = arith.maximumf %103, %104 : vector<16x128xf32>
    %c0_122 = arith.constant 0 : index
    %c2_123 = arith.constant 2 : index
    %c0_124 = arith.constant 0 : index
    %c0_125 = arith.constant 0 : index
    %106 = vector.load %arg9[%c0_122, %c2_123, %c0_124, %c0_125] : memref<2x3x8x16xbf16, #tpu.memory_space<vmem>>, vector<1x1x8x16xbf16>
    %107 = vector.shape_cast %106 : vector<1x1x8x16xbf16> to vector<8x16xbf16>
    %108 = arith.truncf %105 : vector<16x128xf32> to vector<16x128xbf16>
    %cst_126 = arith.constant dense<0.000000e+00> : vector<8x128xf32>
    %109 = tpu.matmul %107, %108, %cst_126 {dimension_numbers = #tpu.dot_dimension_numbers<[1], [0], [0], [1], [0, 0, 1, 1], [], []>} : vector<8x16xbf16>, vector<16x128xbf16>, vector<8x128xf32> -> vector<8x128xf32>
    %c0_127 = arith.constant 0 : index
    %c2_128 = arith.constant 2 : index
    %c0_129 = arith.constant 0 : index
    %c0_130 = arith.constant 0 : index
    %110 = vector.load %arg10[%c0_127, %c2_128, %c0_129, %c0_130] : memref<2x3x8x1xf32, #tpu.memory_space<vmem>>, vector<1x1x8x1xf32>
    %111 = vector.shape_cast %110 : vector<1x1x8x1xf32> to vector<8x1xf32>
    %112 = vector.broadcast %111 : vector<8x1xf32> to vector<8x128xf32>
    %113 = arith.addf %109, %112 : vector<8x128xf32>
    %114 = arith.addf %83, %113 : vector<8x128xf32>
    %115 = vector.broadcast %1 : vector<1x128xf32> to vector<8x128xf32>
    %116 = arith.mulf %114, %115 : vector<8x128xf32>
    %c0_131 = arith.constant 0 : index
    %c0_132 = arith.constant 0 : index
    %c0_133 = arith.constant 0 : index
    %117 = vector.load %arg11[%c0_131, %c0_132, %c0_133] : memref<2x6x8xbf16, #tpu.memory_space<vmem>>, vector<1x6x8xbf16>
    %118 = vector.shape_cast %117 : vector<1x6x8xbf16> to vector<6x8xbf16>
    %119 = arith.truncf %116 : vector<8x128xf32> to vector<8x128xbf16>
    %cst_134 = arith.constant dense<0.000000e+00> : vector<6x128xf32>
    %120 = tpu.matmul %118, %119, %cst_134 {dimension_numbers = #tpu.dot_dimension_numbers<[1], [0], [0], [1], [0, 0, 1, 1], [], []>} : vector<6x8xbf16>, vector<8x128xbf16>, vector<6x128xf32> -> vector<6x128xf32>
    %c0_135 = arith.constant 0 : index
    %c0_136 = arith.constant 0 : index
    %c0_137 = arith.constant 0 : index
    %121 = vector.load %arg12[%c0_135, %c0_136, %c0_137] : memref<2x6x1xf32, #tpu.memory_space<vmem>>, vector<1x6x1xf32>
    %122 = vector.shape_cast %121 : vector<1x6x1xf32> to vector<6x1xf32>
    %123 = vector.broadcast %122 : vector<6x1xf32> to vector<6x128xf32>
    %124 = arith.addf %120, %123 : vector<6x128xf32>
    %125 = vector.broadcast %1 : vector<1x128xf32> to vector<6x128xf32>
    %126 = arith.mulf %124, %125 : vector<6x128xf32>
    %c0_138 = arith.constant 0 : index
    %c0_139 = arith.constant 0 : index
    %c0_140 = arith.constant 0 : index
    %c0_141 = arith.constant 0 : index
    %127 = vector.load %arg13[%c0_138, %c0_139, %c0_140, %c0_141] : memref<1x2x6x128xf32, #tpu.memory_space<vmem>>, vector<1x1x6x128xf32>
    %128 = vector.shape_cast %127 : vector<1x1x6x128xf32> to vector<6x128xf32>
    %129 = vector.shape_cast %126 : vector<6x128xf32> to vector<1x1x6x128xf32>
    tpu.vector_store %arg13[%c0_138, %c0_139, %c0_140, %c0_141], %129 {strides = array<i32>} : memref<1x2x6x128xf32, #tpu.memory_space<vmem>>, vector<1x1x6x128xf32>,
    %cst_142 = arith.constant dense<0xFF800000> : vector<128xf32>
    %130 = vector.multi_reduction <maximumf>, %126, %cst_142 [0] : vector<6x128xf32> to vector<128xf32>
    %131 = vector.shape_cast %130 : vector<128xf32> to vector<1x128xf32>
    %132 = vector.broadcast %131 : vector<1x128xf32> to vector<6x128xf32>
    %133 = arith.subf %126, %132 : vector<6x128xf32>
    %134 = math.exp %133 : vector<6x128xf32>
    %cst_143 = arith.constant dense<0.000000e+00> : vector<128xf32>
    %135 = vector.multi_reduction <add>, %134, %cst_143 [0] : vector<6x128xf32> to vector<128xf32>
    %136 = vector.shape_cast %135 : vector<128xf32> to vector<1x128xf32>
    %137 = tpu.reciprocal %136 {approx = true} : vector<1x128xf32> -> vector<1x128xf32>
    %138 = vector.broadcast %137 : vector<1x128xf32> to vector<6x128xf32>
    %139 = arith.mulf %134, %138 : vector<6x128xf32>
    %140 = vector.broadcast %1 : vector<1x128xf32> to vector<6x128xf32>
    %141 = arith.mulf %139, %140 : vector<6x128xf32>
    %c0_144 = arith.constant 0 : index
    %c0_145 = arith.constant 0 : index
    %c0_146 = arith.constant 0 : index
    %142 = vector.load %arg5[%c0_144, %c0_145, %c0_146] : memref<1x8x6xbf16, #tpu.memory_space<vmem>>, vector<1x8x6xbf16>
    %143 = vector.shape_cast %142 : vector<1x8x6xbf16> to vector<8x6xbf16>
    %144 = arith.truncf %141 : vector<6x128xf32> to vector<6x128xbf16>
    %cst_147 = arith.constant dense<0.000000e+00> : vector<8x128xf32>
    %145 = tpu.matmul %143, %144, %cst_147 {dimension_numbers = #tpu.dot_dimension_numbers<[1], [0], [0], [1], [0, 0, 1, 1], [], []>} : vector<8x6xbf16>, vector<6x128xbf16>, vector<8x128xf32> -> vector<8x128xf32>
    %c0_148 = arith.constant 0 : index
    %c0_149 = arith.constant 0 : index
    %c0_150 = arith.constant 0 : index
    %146 = vector.load %arg6[%c0_148, %c0_149, %c0_150] : memref<1x8x1xf32, #tpu.memory_space<vmem>>, vector<1x8x1xf32>
    %147 = vector.shape_cast %146 : vector<1x8x1xf32> to vector<8x1xf32>
    %148 = vector.broadcast %147 : vector<8x1xf32> to vector<8x128xf32>
    %149 = arith.addf %145, %148 : vector<8x128xf32>
    %150 = vector.broadcast %3 : vector<1x128xf32> to vector<8x128xf32>
    %151 = arith.mulf %149, %150 : vector<8x128xf32>
    %c0_151 = arith.constant 0 : index
    %c128_152 = arith.constant 128 : index
    %152 = vector.load %arg14[%c0_151, %c128_152] : memref<8x384xf32, #tpu.memory_space<vmem>>, vector<8x128xf32>
    tpu.vector_store %arg14[%c0_151, %c128_152], %151 {strides = array<i32>} : memref<8x384xf32, #tpu.memory_space<vmem>>, vector<8x128xf32>,
    %c0_153 = arith.constant 0 : index
    %c126_154 = arith.constant 126 : index
    %153 = vector.load %arg14[%c0_153, %c126_154] : memref<8x384xf32, #tpu.memory_space<vmem>>, vector<8x128xf32>
    %c0_155 = arith.constant 0 : index
    %c0_156 = arith.constant 0 : index
    %154 = vector.load %arg15[%c0_155, %c0_156] : memref<40x128xf32, #tpu.memory_space<vmem>>, vector<8x128xf32>
    tpu.vector_store %arg15[%c0_155, %c0_156], %153 {strides = array<i32>} : memref<40x128xf32, #tpu.memory_space<vmem>>, vector<8x128xf32>,
    %c0_157 = arith.constant 0 : index
    %c127_158 = arith.constant 127 : index
    %155 = vector.load %arg14[%c0_157, %c127_158] : memref<8x384xf32, #tpu.memory_space<vmem>>, vector<8x128xf32>
    %c8_159 = arith.constant 8 : index
    %c0_160 = arith.constant 0 : index
    %156 = vector.load %arg15[%c8_159, %c0_160] : memref<40x128xf32, #tpu.memory_space<vmem>>, vector<8x128xf32>
    tpu.vector_store %arg15[%c8_159, %c0_160], %155 {strides = array<i32>} : memref<40x128xf32, #tpu.memory_space<vmem>>, vector<8x128xf32>,
    %c0_161 = arith.constant 0 : index
    %c128_162 = arith.constant 128 : index
    %157 = vector.load %arg14[%c0_161, %c128_162] : memref<8x384xf32, #tpu.memory_space<vmem>>, vector<8x128xf32>
    %c16_163 = arith.constant 16 : index
    %c0_164 = arith.constant 0 : index
    %158 = vector.load %arg15[%c16_163, %c0_164] : memref<40x128xf32, #tpu.memory_space<vmem>>, vector<8x128xf32>
    tpu.vector_store %arg15[%c16_163, %c0_164], %157 {strides = array<i32>} : memref<40x128xf32, #tpu.memory_space<vmem>>, vector<8x128xf32>,
    %c0_165 = arith.constant 0 : index
    %c129_166 = arith.constant 129 : index
    %159 = vector.load %arg14[%c0_165, %c129_166] : memref<8x384xf32, #tpu.memory_space<vmem>>, vector<8x128xf32>
    %c24_167 = arith.constant 24 : index
    %c0_168 = arith.constant 0 : index
    %160 = vector.load %arg15[%c24_167, %c0_168] : memref<40x128xf32, #tpu.memory_space<vmem>>, vector<8x128xf32>
    tpu.vector_store %arg15[%c24_167, %c0_168], %159 {strides = array<i32>} : memref<40x128xf32, #tpu.memory_space<vmem>>, vector<8x128xf32>,
    %c0_169 = arith.constant 0 : index
    %c130_170 = arith.constant 130 : index
    %161 = vector.load %arg14[%c0_169, %c130_170] : memref<8x384xf32, #tpu.memory_space<vmem>>, vector<8x128xf32>
    %c32_171 = arith.constant 32 : index
    %c0_172 = arith.constant 0 : index
    %162 = vector.load %arg15[%c32_171, %c0_172] : memref<40x128xf32, #tpu.memory_space<vmem>>, vector<8x128xf32>
    tpu.vector_store %arg15[%c32_171, %c0_172], %161 {strides = array<i32>} : memref<40x128xf32, #tpu.memory_space<vmem>>, vector<8x128xf32>,
    %c1_173 = arith.constant 1 : index
    %c0_174 = arith.constant 0 : index
    %c0_175 = arith.constant 0 : index
    %c0_176 = arith.constant 0 : index
    %163 = vector.load %arg7[%c1_173, %c0_174, %c0_175, %c0_176] : memref<2x3x16x40xbf16, #tpu.memory_space<vmem>>, vector<1x1x16x40xbf16>
    %164 = vector.shape_cast %163 : vector<1x1x16x40xbf16> to vector<16x40xbf16>
    %c0_177 = arith.constant 0 : index
    %c0_178 = arith.constant 0 : index
    %165 = vector.load %arg15[%c0_177, %c0_178] : memref<40x128xf32, #tpu.memory_space<vmem>>, vector<40x128xf32>
    %166 = arith.truncf %165 : vector<40x128xf32> to vector<40x128xbf16>
    %cst_179 = arith.constant dense<0.000000e+00> : vector<16x128xf32>
    %167 = tpu.matmul %164, %166, %cst_179 {dimension_numbers = #tpu.dot_dimension_numbers<[1], [0], [0], [1], [0, 0, 1, 1], [], []>} : vector<16x40xbf16>, vector<40x128xbf16>, vector<16x128xf32> -> vector<16x128xf32>
    %c1_180 = arith.constant 1 : index
    %c0_181 = arith.constant 0 : index
    %c0_182 = arith.constant 0 : index
    %c0_183 = arith.constant 0 : index
    %168 = vector.load %arg8[%c1_180, %c0_181, %c0_182, %c0_183] : memref<2x3x16x1xf32, #tpu.memory_space<vmem>>, vector<1x1x16x1xf32>
    %169 = vector.shape_cast %168 : vector<1x1x16x1xf32> to vector<16x1xf32>
    %170 = vector.broadcast %169 : vector<16x1xf32> to vector<16x128xf32>
    %171 = arith.addf %167, %170 : vector<16x128xf32>
    %cst_184 = arith.constant 0.000000e+00 : f32
    %172 = vector.broadcast %cst_184 : f32 to vector<16x128xf32>
    %173 = arith.maximumf %171, %172 : vector<16x128xf32>
    %c1_185 = arith.constant 1 : index
    %c0_186 = arith.constant 0 : index
    %c0_187 = arith.constant 0 : index
    %c0_188 = arith.constant 0 : index
    %174 = vector.load %arg9[%c1_185, %c0_186, %c0_187, %c0_188] : memref<2x3x8x16xbf16, #tpu.memory_space<vmem>>, vector<1x1x8x16xbf16>
    %175 = vector.shape_cast %174 : vector<1x1x8x16xbf16> to vector<8x16xbf16>
    %176 = arith.truncf %173 : vector<16x128xf32> to vector<16x128xbf16>
    %cst_189 = arith.constant dense<0.000000e+00> : vector<8x128xf32>
    %177 = tpu.matmul %175, %176, %cst_189 {dimension_numbers = #tpu.dot_dimension_numbers<[1], [0], [0], [1], [0, 0, 1, 1], [], []>} : vector<8x16xbf16>, vector<16x128xbf16>, vector<8x128xf32> -> vector<8x128xf32>
    %c1_190 = arith.constant 1 : index
    %c0_191 = arith.constant 0 : index
    %c0_192 = arith.constant 0 : index
    %c0_193 = arith.constant 0 : index
    %178 = vector.load %arg10[%c1_190, %c0_191, %c0_192, %c0_193] : memref<2x3x8x1xf32, #tpu.memory_space<vmem>>, vector<1x1x8x1xf32>
    %179 = vector.shape_cast %178 : vector<1x1x8x1xf32> to vector<8x1xf32>
    %180 = vector.broadcast %179 : vector<8x1xf32> to vector<8x128xf32>
    %181 = arith.addf %177, %180 : vector<8x128xf32>
    %182 = arith.addf %151, %181 : vector<8x128xf32>
    %183 = vector.broadcast %1 : vector<1x128xf32> to vector<8x128xf32>
    %184 = arith.mulf %182, %183 : vector<8x128xf32>
    %c0_194 = arith.constant 0 : index
    %c128_195 = arith.constant 128 : index
    %185 = vector.load %arg14[%c0_194, %c128_195] : memref<8x384xf32, #tpu.memory_space<vmem>>, vector<8x128xf32>
    tpu.vector_store %arg14[%c0_194, %c128_195], %184 {strides = array<i32>} : memref<8x384xf32, #tpu.memory_space<vmem>>, vector<8x128xf32>,
    %c0_196 = arith.constant 0 : index
    %c124_197 = arith.constant 124 : index
    %186 = vector.load %arg14[%c0_196, %c124_197] : memref<8x384xf32, #tpu.memory_space<vmem>>, vector<8x128xf32>
    %c0_198 = arith.constant 0 : index
    %c0_199 = arith.constant 0 : index
    %187 = vector.load %arg15[%c0_198, %c0_199] : memref<40x128xf32, #tpu.memory_space<vmem>>, vector<8x128xf32>
    tpu.vector_store %arg15[%c0_198, %c0_199], %186 {strides = array<i32>} : memref<40x128xf32, #tpu.memory_space<vmem>>, vector<8x128xf32>,
    %c0_200 = arith.constant 0 : index
    %c126_201 = arith.constant 126 : index
    %188 = vector.load %arg14[%c0_200, %c126_201] : memref<8x384xf32, #tpu.memory_space<vmem>>, vector<8x128xf32>
    %c8_202 = arith.constant 8 : index
    %c0_203 = arith.constant 0 : index
    %189 = vector.load %arg15[%c8_202, %c0_203] : memref<40x128xf32, #tpu.memory_space<vmem>>, vector<8x128xf32>
    tpu.vector_store %arg15[%c8_202, %c0_203], %188 {strides = array<i32>} : memref<40x128xf32, #tpu.memory_space<vmem>>, vector<8x128xf32>,
    %c0_204 = arith.constant 0 : index
    %c128_205 = arith.constant 128 : index
    %190 = vector.load %arg14[%c0_204, %c128_205] : memref<8x384xf32, #tpu.memory_space<vmem>>, vector<8x128xf32>
    %c16_206 = arith.constant 16 : index
    %c0_207 = arith.constant 0 : index
    %191 = vector.load %arg15[%c16_206, %c0_207] : memref<40x128xf32, #tpu.memory_space<vmem>>, vector<8x128xf32>
    tpu.vector_store %arg15[%c16_206, %c0_207], %190 {strides = array<i32>} : memref<40x128xf32, #tpu.memory_space<vmem>>, vector<8x128xf32>,
    %c0_208 = arith.constant 0 : index
    %c130_209 = arith.constant 130 : index
    %192 = vector.load %arg14[%c0_208, %c130_209] : memref<8x384xf32, #tpu.memory_space<vmem>>, vector<8x128xf32>
    %c24_210 = arith.constant 24 : index
    %c0_211 = arith.constant 0 : index
    %193 = vector.load %arg15[%c24_210, %c0_211] : memref<40x128xf32, #tpu.memory_space<vmem>>, vector<8x128xf32>
    tpu.vector_store %arg15[%c24_210, %c0_211], %192 {strides = array<i32>} : memref<40x128xf32, #tpu.memory_space<vmem>>, vector<8x128xf32>,
    %c0_212 = arith.constant 0 : index
    %c132_213 = arith.constant 132 : index
    %194 = vector.load %arg14[%c0_212, %c132_213] : memref<8x384xf32, #tpu.memory_space<vmem>>, vector<8x128xf32>
    %c32_214 = arith.constant 32 : index
    %c0_215 = arith.constant 0 : index
    %195 = vector.load %arg15[%c32_214, %c0_215] : memref<40x128xf32, #tpu.memory_space<vmem>>, vector<8x128xf32>
    tpu.vector_store %arg15[%c32_214, %c0_215], %194 {strides = array<i32>} : memref<40x128xf32, #tpu.memory_space<vmem>>, vector<8x128xf32>,
    %c1_216 = arith.constant 1 : index
    %c1_217 = arith.constant 1 : index
    %c0_218 = arith.constant 0 : index
    %c0_219 = arith.constant 0 : index
    %196 = vector.load %arg7[%c1_216, %c1_217, %c0_218, %c0_219] : memref<2x3x16x40xbf16, #tpu.memory_space<vmem>>, vector<1x1x16x40xbf16>
    %197 = vector.shape_cast %196 : vector<1x1x16x40xbf16> to vector<16x40xbf16>
    %c0_220 = arith.constant 0 : index
    %c0_221 = arith.constant 0 : index
    %198 = vector.load %arg15[%c0_220, %c0_221] : memref<40x128xf32, #tpu.memory_space<vmem>>, vector<40x128xf32>
    %199 = arith.truncf %198 : vector<40x128xf32> to vector<40x128xbf16>
    %cst_222 = arith.constant dense<0.000000e+00> : vector<16x128xf32>
    %200 = tpu.matmul %197, %199, %cst_222 {dimension_numbers = #tpu.dot_dimension_numbers<[1], [0], [0], [1], [0, 0, 1, 1], [], []>} : vector<16x40xbf16>, vector<40x128xbf16>, vector<16x128xf32> -> vector<16x128xf32>
    %c1_223 = arith.constant 1 : index
    %c1_224 = arith.constant 1 : index
    %c0_225 = arith.constant 0 : index
    %c0_226 = arith.constant 0 : index
    %201 = vector.load %arg8[%c1_223, %c1_224, %c0_225, %c0_226] : memref<2x3x16x1xf32, #tpu.memory_space<vmem>>, vector<1x1x16x1xf32>
    %202 = vector.shape_cast %201 : vector<1x1x16x1xf32> to vector<16x1xf32>
    %203 = vector.broadcast %202 : vector<16x1xf32> to vector<16x128xf32>
    %204 = arith.addf %200, %203 : vector<16x128xf32>
    %cst_227 = arith.constant 0.000000e+00 : f32
    %205 = vector.broadcast %cst_227 : f32 to vector<16x128xf32>
    %206 = arith.maximumf %204, %205 : vector<16x128xf32>
    %c1_228 = arith.constant 1 : index
    %c1_229 = arith.constant 1 : index
    %c0_230 = arith.constant 0 : index
    %c0_231 = arith.constant 0 : index
    %207 = vector.load %arg9[%c1_228, %c1_229, %c0_230, %c0_231] : memref<2x3x8x16xbf16, #tpu.memory_space<vmem>>, vector<1x1x8x16xbf16>
    %208 = vector.shape_cast %207 : vector<1x1x8x16xbf16> to vector<8x16xbf16>
    %209 = arith.truncf %206 : vector<16x128xf32> to vector<16x128xbf16>
    %cst_232 = arith.constant dense<0.000000e+00> : vector<8x128xf32>
    %210 = tpu.matmul %208, %209, %cst_232 {dimension_numbers = #tpu.dot_dimension_numbers<[1], [0], [0], [1], [0, 0, 1, 1], [], []>} : vector<8x16xbf16>, vector<16x128xbf16>, vector<8x128xf32> -> vector<8x128xf32>
    %c1_233 = arith.constant 1 : index
    %c1_234 = arith.constant 1 : index
    %c0_235 = arith.constant 0 : index
    %c0_236 = arith.constant 0 : index
    %211 = vector.load %arg10[%c1_233, %c1_234, %c0_235, %c0_236] : memref<2x3x8x1xf32, #tpu.memory_space<vmem>>, vector<1x1x8x1xf32>
    %212 = vector.shape_cast %211 : vector<1x1x8x1xf32> to vector<8x1xf32>
    %213 = vector.broadcast %212 : vector<8x1xf32> to vector<8x128xf32>
    %214 = arith.addf %210, %213 : vector<8x128xf32>
    %215 = arith.addf %184, %214 : vector<8x128xf32>
    %216 = vector.broadcast %1 : vector<1x128xf32> to vector<8x128xf32>
    %217 = arith.mulf %215, %216 : vector<8x128xf32>
    %c0_237 = arith.constant 0 : index
    %c128_238 = arith.constant 128 : index
    %218 = vector.load %arg14[%c0_237, %c128_238] : memref<8x384xf32, #tpu.memory_space<vmem>>, vector<8x128xf32>
    tpu.vector_store %arg14[%c0_237, %c128_238], %217 {strides = array<i32>} : memref<8x384xf32, #tpu.memory_space<vmem>>, vector<8x128xf32>,
    %c0_239 = arith.constant 0 : index
    %c120_240 = arith.constant 120 : index
    %219 = vector.load %arg14[%c0_239, %c120_240] : memref<8x384xf32, #tpu.memory_space<vmem>>, vector<8x128xf32>
    %c0_241 = arith.constant 0 : index
    %c0_242 = arith.constant 0 : index
    %220 = vector.load %arg15[%c0_241, %c0_242] : memref<40x128xf32, #tpu.memory_space<vmem>>, vector<8x128xf32>
    tpu.vector_store %arg15[%c0_241, %c0_242], %219 {strides = array<i32>} : memref<40x128xf32, #tpu.memory_space<vmem>>, vector<8x128xf32>,
    %c0_243 = arith.constant 0 : index
    %c124_244 = arith.constant 124 : index
    %221 = vector.load %arg14[%c0_243, %c124_244] : memref<8x384xf32, #tpu.memory_space<vmem>>, vector<8x128xf32>
    %c8_245 = arith.constant 8 : index
    %c0_246 = arith.constant 0 : index
    %222 = vector.load %arg15[%c8_245, %c0_246] : memref<40x128xf32, #tpu.memory_space<vmem>>, vector<8x128xf32>
    tpu.vector_store %arg15[%c8_245, %c0_246], %221 {strides = array<i32>} : memref<40x128xf32, #tpu.memory_space<vmem>>, vector<8x128xf32>,
    %c0_247 = arith.constant 0 : index
    %c128_248 = arith.constant 128 : index
    %223 = vector.load %arg14[%c0_247, %c128_248] : memref<8x384xf32, #tpu.memory_space<vmem>>, vector<8x128xf32>
    %c16_249 = arith.constant 16 : index
    %c0_250 = arith.constant 0 : index
    %224 = vector.load %arg15[%c16_249, %c0_250] : memref<40x128xf32, #tpu.memory_space<vmem>>, vector<8x128xf32>
    tpu.vector_store %arg15[%c16_249, %c0_250], %223 {strides = array<i32>} : memref<40x128xf32, #tpu.memory_space<vmem>>, vector<8x128xf32>,
    %c0_251 = arith.constant 0 : index
    %c132_252 = arith.constant 132 : index
    %225 = vector.load %arg14[%c0_251, %c132_252] : memref<8x384xf32, #tpu.memory_space<vmem>>, vector<8x128xf32>
    %c24_253 = arith.constant 24 : index
    %c0_254 = arith.constant 0 : index
    %226 = vector.load %arg15[%c24_253, %c0_254] : memref<40x128xf32, #tpu.memory_space<vmem>>, vector<8x128xf32>
    tpu.vector_store %arg15[%c24_253, %c0_254], %225 {strides = array<i32>} : memref<40x128xf32, #tpu.memory_space<vmem>>, vector<8x128xf32>,
    %c0_255 = arith.constant 0 : index
    %c136_256 = arith.constant 136 : index
    %227 = vector.load %arg14[%c0_255, %c136_256] : memref<8x384xf32, #tpu.memory_space<vmem>>, vector<8x128xf32>
    %c32_257 = arith.constant 32 : index
    %c0_258 = arith.constant 0 : index
    %228 = vector.load %arg15[%c32_257, %c0_258] : memref<40x128xf32, #tpu.memory_space<vmem>>, vector<8x128xf32>
    tpu.vector_store %arg15[%c32_257, %c0_258], %227 {strides = array<i32>} : memref<40x128xf32, #tpu.memory_space<vmem>>, vector<8x128xf32>,
    %c1_259 = arith.constant 1 : index
    %c2_260 = arith.constant 2 : index
    %c0_261 = arith.constant 0 : index
    %c0_262 = arith.constant 0 : index
    %229 = vector.load %arg7[%c1_259, %c2_260, %c0_261, %c0_262] : memref<2x3x16x40xbf16, #tpu.memory_space<vmem>>, vector<1x1x16x40xbf16>
    %230 = vector.shape_cast %229 : vector<1x1x16x40xbf16> to vector<16x40xbf16>
    %c0_263 = arith.constant 0 : index
    %c0_264 = arith.constant 0 : index
    %231 = vector.load %arg15[%c0_263, %c0_264] : memref<40x128xf32, #tpu.memory_space<vmem>>, vector<40x128xf32>
    %232 = arith.truncf %231 : vector<40x128xf32> to vector<40x128xbf16>
    %cst_265 = arith.constant dense<0.000000e+00> : vector<16x128xf32>
    %233 = tpu.matmul %230, %232, %cst_265 {dimension_numbers = #tpu.dot_dimension_numbers<[1], [0], [0], [1], [0, 0, 1, 1], [], []>} : vector<16x40xbf16>, vector<40x128xbf16>, vector<16x128xf32> -> vector<16x128xf32>
    %c1_266 = arith.constant 1 : index
    %c2_267 = arith.constant 2 : index
    %c0_268 = arith.constant 0 : index
    %c0_269 = arith.constant 0 : index
    %234 = vector.load %arg8[%c1_266, %c2_267, %c0_268, %c0_269] : memref<2x3x16x1xf32, #tpu.memory_space<vmem>>, vector<1x1x16x1xf32>
    %235 = vector.shape_cast %234 : vector<1x1x16x1xf32> to vector<16x1xf32>
    %236 = vector.broadcast %235 : vector<16x1xf32> to vector<16x128xf32>
    %237 = arith.addf %233, %236 : vector<16x128xf32>
    %cst_270 = arith.constant 0.000000e+00 : f32
    %238 = vector.broadcast %cst_270 : f32 to vector<16x128xf32>
    %239 = arith.maximumf %237, %238 : vector<16x128xf32>
    %c1_271 = arith.constant 1 : index
    %c2_272 = arith.constant 2 : index
    %c0_273 = arith.constant 0 : index
    %c0_274 = arith.constant 0 : index
    %240 = vector.load %arg9[%c1_271, %c2_272, %c0_273, %c0_274] : memref<2x3x8x16xbf16, #tpu.memory_space<vmem>>, vector<1x1x8x16xbf16>
    %241 = vector.shape_cast %240 : vector<1x1x8x16xbf16> to vector<8x16xbf16>
    %242 = arith.truncf %239 : vector<16x128xf32> to vector<16x128xbf16>
    %cst_275 = arith.constant dense<0.000000e+00> : vector<8x128xf32>
    %243 = tpu.matmul %241, %242, %cst_275 {dimension_numbers = #tpu.dot_dimension_numbers<[1], [0], [0], [1], [0, 0, 1, 1], [], []>} : vector<8x16xbf16>, vector<16x128xbf16>, vector<8x128xf32> -> vector<8x128xf32>
    %c1_276 = arith.constant 1 : index
    %c2_277 = arith.constant 2 : index
    %c0_278 = arith.constant 0 : index
    %c0_279 = arith.constant 0 : index
    %244 = vector.load %arg10[%c1_276, %c2_277, %c0_278, %c0_279] : memref<2x3x8x1xf32, #tpu.memory_space<vmem>>, vector<1x1x8x1xf32>
    %245 = vector.shape_cast %244 : vector<1x1x8x1xf32> to vector<8x1xf32>
    %246 = vector.broadcast %245 : vector<8x1xf32> to vector<8x128xf32>
    %247 = arith.addf %243, %246 : vector<8x128xf32>
    %248 = arith.addf %217, %247 : vector<8x128xf32>
    %249 = vector.broadcast %1 : vector<1x128xf32> to vector<8x128xf32>
    %250 = arith.mulf %248, %249 : vector<8x128xf32>
    %c1_280 = arith.constant 1 : index
    %c0_281 = arith.constant 0 : index
    %c0_282 = arith.constant 0 : index
    %251 = vector.load %arg11[%c1_280, %c0_281, %c0_282] : memref<2x6x8xbf16, #tpu.memory_space<vmem>>, vector<1x6x8xbf16>
    %252 = vector.shape_cast %251 : vector<1x6x8xbf16> to vector<6x8xbf16>
    %253 = arith.truncf %250 : vector<8x128xf32> to vector<8x128xbf16>
    %cst_283 = arith.constant dense<0.000000e+00> : vector<6x128xf32>
    %254 = tpu.matmul %252, %253, %cst_283 {dimension_numbers = #tpu.dot_dimension_numbers<[1], [0], [0], [1], [0, 0, 1, 1], [], []>} : vector<6x8xbf16>, vector<8x128xbf16>, vector<6x128xf32> -> vector<6x128xf32>
    %c1_284 = arith.constant 1 : index
    %c0_285 = arith.constant 0 : index
    %c0_286 = arith.constant 0 : index
    %255 = vector.load %arg12[%c1_284, %c0_285, %c0_286] : memref<2x6x1xf32, #tpu.memory_space<vmem>>, vector<1x6x1xf32>
    %256 = vector.shape_cast %255 : vector<1x6x1xf32> to vector<6x1xf32>
    %257 = vector.broadcast %256 : vector<6x1xf32> to vector<6x128xf32>
    %258 = arith.addf %254, %257 : vector<6x128xf32>
    %259 = vector.broadcast %1 : vector<1x128xf32> to vector<6x128xf32>
    %260 = arith.mulf %258, %259 : vector<6x128xf32>
    %c0_287 = arith.constant 0 : index
    %c1_288 = arith.constant 1 : index
    %c0_289 = arith.constant 0 : index
    %c0_290 = arith.constant 0 : index
    %261 = vector.load %arg13[%c0_287, %c1_288, %c0_289, %c0_290] : memref<1x2x6x128xf32, #tpu.memory_space<vmem>>, vector<1x1x6x128xf32>
    %262 = vector.shape_cast %261 : vector<1x1x6x128xf32> to vector<6x128xf32>
    %263 = vector.shape_cast %260 : vector<6x128xf32> to vector<1x1x6x128xf32>
    tpu.vector_store %arg13[%c0_287, %c1_288, %c0_289, %c0_290], %263 {strides = array<i32>} : memref<1x2x6x128xf32, #tpu.memory_space<vmem>>, vector<1x1x6x128xf32>,
    return
  }
  func.func @transform_0(%arg0: i32) -> (i32, i32, i32) {
    %c0_i32 = arith.constant 0 : i32
    %c0_i32_0 = arith.constant 0 : i32
    %c0_i32_1 = arith.constant 0 : i32
    return %arg0, %c0_i32, %c0_i32_0 : i32, i32, i32
  }
  func.func @transform_1(%arg0: i32) -> (i32, i32, i32) {
    %c0_i32 = arith.constant 0 : i32
    %c0_i32_0 = arith.constant 0 : i32
    %c0_i32_1 = arith.constant 0 : i32
    return %arg0, %c0_i32, %c0_i32_0 : i32, i32, i32
  }
  func.func @transform_2(%arg0: i32) -> (i32, i32) {
    %c0_i32 = arith.constant 0 : i32
    %c0_i32_0 = arith.constant 0 : i32
    %c0_i32_1 = arith.constant 0 : i32
    return %c0_i32, %c0_i32_0 : i32, i32
  }
  func.func @transform_3(%arg0: i32) -> (i32, i32) {
    %c0_i32 = arith.constant 0 : i32
    %c0_i32_0 = arith.constant 0 : i32
    %c0_i32_1 = arith.constant 0 : i32
    return %c0_i32, %c0_i32_0 : i32, i32
  }
  func.func @transform_4(%arg0: i32) -> (i32, i32, i32) {
    %c0_i32 = arith.constant 0 : i32
    %c0_i32_0 = arith.constant 0 : i32
    %c0_i32_1 = arith.constant 0 : i32
    %c0_i32_2 = arith.constant 0 : i32
    return %c0_i32, %c0_i32_0, %c0_i32_1 : i32, i32, i32
  }
  func.func @transform_5(%arg0: i32) -> (i32, i32, i32) {
    %c0_i32 = arith.constant 0 : i32
    %c0_i32_0 = arith.constant 0 : i32
    %c0_i32_1 = arith.constant 0 : i32
    %c0_i32_2 = arith.constant 0 : i32
    return %c0_i32, %c0_i32_0, %c0_i32_1 : i32, i32, i32
  }
  func.func @transform_6(%arg0: i32) -> (i32, i32, i32, i32) {
    %c0_i32 = arith.constant 0 : i32
    %c0_i32_0 = arith.constant 0 : i32
    %c0_i32_1 = arith.constant 0 : i32
    %c0_i32_2 = arith.constant 0 : i32
    %c0_i32_3 = arith.constant 0 : i32
    return %c0_i32, %c0_i32_0, %c0_i32_1, %c0_i32_2 : i32, i32, i32, i32
  }
  func.func @transform_7(%arg0: i32) -> (i32, i32, i32, i32) {
    %c0_i32 = arith.constant 0 : i32
    %c0_i32_0 = arith.constant 0 : i32
    %c0_i32_1 = arith.constant 0 : i32
    %c0_i32_2 = arith.constant 0 : i32
    %c0_i32_3 = arith.constant 0 : i32
    return %c0_i32, %c0_i32_0, %c0_i32_1, %c0_i32_2 : i32, i32, i32, i32
  }
  func.func @transform_8(%arg0: i32) -> (i32, i32, i32, i32) {
    %c0_i32 = arith.constant 0 : i32
    %c0_i32_0 = arith.constant 0 : i32
    %c0_i32_1 = arith.constant 0 : i32
    %c0_i32_2 = arith.constant 0 : i32
    %c0_i32_3 = arith.constant 0 : i32
    return %c0_i32, %c0_i32_0, %c0_i32_1, %c0_i32_2 : i32, i32, i32, i32
  }
  func.func @transform_9(%arg0: i32) -> (i32, i32, i32, i32) {
    %c0_i32 = arith.constant 0 : i32
    %c0_i32_0 = arith.constant 0 : i32
    %c0_i32_1 = arith.constant 0 : i32
    %c0_i32_2 = arith.constant 0 : i32
    %c0_i32_3 = arith.constant 0 : i32
    return %c0_i32, %c0_i32_0, %c0_i32_1, %c0_i32_2 : i32, i32, i32, i32
  }
  func.func @transform_10(%arg0: i32) -> (i32, i32, i32) {
    %c0_i32 = arith.constant 0 : i32
    %c0_i32_0 = arith.constant 0 : i32
    %c0_i32_1 = arith.constant 0 : i32
    %c0_i32_2 = arith.constant 0 : i32
    return %c0_i32, %c0_i32_0, %c0_i32_1 : i32, i32, i32
  }
  func.func @transform_11(%arg0: i32) -> (i32, i32, i32) {
    %c0_i32 = arith.constant 0 : i32
    %c0_i32_0 = arith.constant 0 : i32
    %c0_i32_1 = arith.constant 0 : i32
    %c0_i32_2 = arith.constant 0 : i32
    return %c0_i32, %c0_i32_0, %c0_i32_1 : i32, i32, i32
  }
  func.func @transform_12(%arg0: i32) -> (i32, i32, i32, i32) {
    %c0_i32 = arith.constant 0 : i32
    %c0_i32_0 = arith.constant 0 : i32
    %c0_i32_1 = arith.constant 0 : i32
    %c0_i32_2 = arith.constant 0 : i32
    return %arg0, %c0_i32, %c0_i32_0, %c0_i32_1 : i32, i32, i32, i32
  }
}

</mosaic_0001>

<bundles_post_ra>
// kernel: model_forward.1
= control target key start
LH: loop header
LB: loop body
LE: loop exit
PB: predicated region body
PF: predicated region fallthrough
CT: control target
= control target key end

     0   :  { %s2313_s21 = smov 0   ;;  %s2656_s0 = inlined_call_operand.vmem [shape: f32[2,4,128], index: 0, kind: input, shape index: {}]   ;;  %s2657_s1 = inlined_call_operand.vmem [shape: f32[2,2,128], index: 1, kind: input, shape index: {}]   ;;  %s2658_s2 = inlined_call_operand.vmem [shape: bf16[8,4], index: 2, kind: input, shape index: {}]   ;;  %s2659_s3 = inlined_call_operand.vmem [shape: f32[8,1], index: 3, kind: input, shape index: {}]   ;;  %s2660_s4 = inlined_call_operand.vmem [shape: bf16[1,8,6], index: 4, kind: input, shape index: {}]   ;;  %s2661_s5 = inlined_call_operand.vmem [shape: f32[1,8,1], index: 5, kind: input, shape index: {}]   ;;  %s2662_s6 = inlined_call_operand.vmem [shape: bf16[2,3,16,40], index: 6, kind: input, shape index: {}]   ;;  %s2663_s7 = inlined_call_operand.vmem [shape: f32[2,3,16,1], index: 7, kind: input, shape index: {}]   ;;  %s2664_s8 = inlined_call_operand.vmem [shape: bf16[2,3,8,16], index: 8, kind: input, shape index: {}]   ;;  %s2665_s9 = inlined_call_operand.vmem [shape: f32[2,3,8,1], index: 9, kind: input, shape index: {}]   ;;  %s2666_s10 = inlined_call_operand.vmem [shape: bf16[2,6,8], index: 10, kind: input, shape index: {}]   ;;  %s2667_s11 = inlined_call_operand.vmem [shape: f32[2,6,1], index: 11, kind: input, shape index: {}]   ;;  %s2668_s12 = inlined_call_operand.vmem [shape: f32[2,2,6,128], index: 12, kind: output, shape index: {}]  }
   0x1 LB: > { %s1845_s22 = sadd.s32 4294967295, %s2235_s21   ;;  %p1849_p0 = scmp.ge.s32.totalorder %s2235_s21, 1  ;;  %s2235_s21 = sphi %s2313_s21, %s22_s21  }
   0x2   : > { %p370_p1 = scmp.lt.s32.totalorder %s2235_s21, 3 }
   0x4   : > { %p371_p2 = pnand %p1849_p0, %p370_p1 }
   0x5   : > { %p415_p3 = scmp.lt.s32.totalorder (!%p371_p2), %s1845_s22, 1  ;;  %v2237_v0 = vmov (!%p371_p2), 0.0   ;;  %vm2238_vm0 = vmmov (!%p371_p2), 0   ;;  %v436_v1 = vld [vmem:[%s2659_s3] sm:$0xff] (!%p371_p2)  ;;  %v2239_v2 = vmov (!%p371_p2), 0   ;;  %vm446_vm1 = vcmask (!%p371_p2), 1041408  }
   0x6   : > { %374 = sbr.rel (%p371_p2) target bundleno = 4406 (0x1136), region = 68  ;;  %1958 = vmatprep.subr.bf16.mxu0 (!%p371_p2), %v2237_v0  ;;  %1960 = vmatprep.mubr.msk.bf16.mxu0 (!%p371_p2), %vm2238_vm0, %v2237_v0  ;;  %v435_v6 = vld [vmem:[%s2658_s2] sm:$0xf] (!%p371_p2)  ;;  %vm442_vm2 = vcmask (!%p371_p2), 31744   ;;  %s2240_s17 = smov (!%p371_p2), 1   ;;  %v557_v17 = vld [vmem:[%s2663_s7 + $0x8] sm:$0xff] (!%p371_p2) }
   0x7   : > { %2097 = vset.pattern.permute.xlu0 (!%p371_p2), %v2239_v2  ;;  %1964 = vmatprep.subr.bf16.mxu1 (!%p371_p2), %v2237_v0  ;;  %s2241_s18 = smov (!%p371_p2), 2   ;;  %s2242_s19 = smov (!%p371_p2), 127   ;;  %v556_v18 = vld [vmem:[%s2663_s7] sm:$0xff] (!%p371_p2)  ;;  %vm504_vm3 = vcmask (!%p371_p2), 15360   ;;  %vm516_vm4 = vcmask (!%p371_p2), 7168   ;;  %vm530_vm5 = vcmask (!%p371_p2), 1039360  }
   0x8   : > { %439 = vperm.xlu0 (!%p371_p2), %2097, %v436_v1   ;;  %1970 = vmatprep.mubr.msk.bf16.mxu1 (!%p371_p2), %vm2238_vm0, %v2237_v0  ;;  %s2243_s20 = smov (!%p371_p2), 126   ;;  %v626_v19 = vld [vmem:[%s2665_s9] sm:$0xff] (!%p371_p2)  ;;  %vm542_vm6 = vcmask (!%p371_p2), 1031168   ;;  %vm577_vm7 = vcmask (!%p371_p2), 1043456   ;;  %vm573_vm8 = vcmask (!%p371_p2), 326656   ;;  %vm632_vm9 = vcmask (!%p371_p2), 130048  }
   0x9   : > { %2118 = vset.pattern.permute.xlu1 (!%p371_p2), %v2239_v2  ;;  %v2219_v40 = vld [vmem:[%s2662_s6] sm:$0xff] (!%p371_p2)   ;;  %s2244_s15 = smov (!%p371_p2), 4   ;;  %v1863_v1 = vld [vmem:[%s2663_s7 + $0x18] sm:$0xff] (!%p371_p2)  ;;  %v1862_v2 = vld [vmem:[%s2663_s7 + $0x10] sm:$0xff] (!%p371_p2)  ;;  %vm726_vm10 = vcmask (!%p371_p2), 1014784   ;;  %s2670_s23 = smov (!%p371_p2), 8  }
   0xa   : > { %v624_v52 = vld [vmem:[%s2664_s8] sm:$0xf] (!%p371_p2)  ;;  %s2669_s24 = smov (!%p371_p2), 120   ;;  %vm872_vm11 = vcmask (!%p371_p2), 64512   ;;  %vm908_vm12 = vcmask (!%p371_p2), 982016   ;;  %vm1101_vm13 = vcmask (!%p371_p2), 1045504  }
   0xb   : > { %vm1134_vm14 = vcmask (!%p371_p2), 1042432   ;;  %vm1130_vm15 = vcmask (!%p371_p2), 48128  }
   0xd   : > { %s2674_s22 = smov (!%p415_p3, %s1845_s22), 1 }
   0xe   : > { %s1850_s25 = sshll.u32 %s2674_s22, 2  ;;  %s1851_s13 = sshll.u32 %s2674_s22, 1 }
   0xf   : > { %s418_s28 = scalar_lea.vmem %s2656_s0, %s1850_s25  ;;  %s2347_s16 = scalar_lea.vmem %s2657_s1, %s1851_s13 }
  0x10   : > { %v433_v3 = vld [vmem:[%s418_s28] sm:$0xf]  ;;  %s1913_s29 = sshll.u32 %s2674_s22, 4 }
  0x11   : > { %v434_v4 = vpack.c.bf16 %v433_v3, %v433_v3  ;;  %v2350_v8 = vld [vmem:[%s2347_s16 + $0x1] ss:$0 sm:$0xff]  ;;  %v2395_v57 = vld [vmem:[%s2347_s16] ss:$0 sm:$0xff]  ;;  %s2245_s16 = smov 124   ;;  %v1867_v3 = vld [vmem:[%s2665_s9 + $0x8] sm:$0xff]  ;;  %s2503_s14 = scalar_lea.vmem %s2668_s12, %s1913_s29 }
  0x12   : > { %s2672_s29 = smov 120  }
  0x13   : > { %v448_v5 = vsel %vm446_vm1, %v434_v4, 0 }
  0x14   : > { %1959 = vmatpush3.bf16.msra.mxu0 %v448_v5 }
  0x15   : > { %1974 = vmatprep.subr.bf16.mxu0 %v2237_v0 }
  0x17   : > { %1961 = vmatmul.mubr.msk.bf16.vlgmr.msra.gmra.mrb[0].mxu0 %vm442_vm2, %v435_v6 }
  0x18   : > { %1976 = vmatprep.mubr.msk.bf16.mxu0 %vm2238_vm0, %v2237_v0 }
  0x87   : > { %v440_v7 = vpop.permute.xlu0 %439 }
  0xea   : > { %v484_v9 = vpop.f32.mrb[0].mxu0 }
  0xeb   : > { %v485_v10 = vadd.f32 %v484_v9, %v440_v7  ;;  %v1962_v11 = vpop.f32.mrb[1].mxu0 }
  0xec   : > { %v487_v12 = vpop.f32.mrb[2].mxu0 }
  0xed   : > { %v2353_v13 = vmul.f32 %v2350_v8, %v485_v10  ;;  %v1963_v14 = vpop.f32.mrb[3].mxu0 }
  0xef   : > { %v2103_v15 = vpack.i.bf16 %v2353_v13, %v2237_v0  ;;  %v2108_v16 = vpack.i.bf16 %v2237_v0, %v2353_v13 }
  0xf1   : > { %2104 = vrot.lane.b32.xlu1 %v2103_v15, %s2240_s17  ;;  %2099 = vrot.lane.b32.xlu0 %v2103_v15, %s2241_s18 }
  0xf5   : > { %2109 = vrot.lane.b32.xlu1 %v2108_v16, %s2242_s19  ;;  %2114 = vrot.lane.b32.xlu0 %v2108_v16, %s2243_s20 }
  0xf9   : > { %565 = vperm.xlu0 %2097, %v557_v17   ;;  %560 = vperm.xlu1 %2118, %v556_v18  }
  0xfd   : > { %629 = vperm.xlu1 %2118, %v626_v19  }
 0x163   : > { %v2105_v20 = vpop.permute.xlu1 %2104  ;;  %v2100_v21 = vpop.permute.xlu0 %2099 }
 0x164   : > { %v2107_v22 = vunpack.i.h.bf16 %v2105_v20  ;;  %v2106_v23 = vunpack.i.l.bf16 %v2105_v20  ;;  %v2102_v24 = vunpack.i.h.bf16 %v2100_v21  ;;  %v2101_v25 = vunpack.i.l.bf16 %v2100_v21 }
 0x166   : > { %v505_v26 = vsel %vm504_vm3, %v2101_v25, %v2102_v24  ;;  %v517_v27 = vsel %vm516_vm4, %v2106_v23, %v2107_v22  ;;  %v2220_v25 = vld [vmem:[%s2662_s6 + $0x8] sm:$0xff]  }
 0x167   : > { %v2110_v28 = vpop.permute.xlu1 %2109  ;;  %v2115_v29 = vpop.permute.xlu0 %2114  ;;  %v553_v30 = vpack.c.bf16 %v517_v27, %v505_v26 }
 0x168   : > { %v2112_v31 = vunpack.i.h.bf16 %v2110_v28  ;;  %v2111_v32 = vunpack.i.l.bf16 %v2110_v28  ;;  %v2117_v33 = vunpack.i.h.bf16 %v2115_v29  ;;  %v2116_v34 = vunpack.i.l.bf16 %v2115_v29 }
 0x169   : > { %1965 = vmatpush3.bf16.msra.mxu1 %v553_v30 }
 0x16a   : > { %1966 = vmatprep.subr.bf16.mxu1 %v2237_v0  ;;  %v531_v35 = vsel %vm530_vm5, %v2111_v32, %v2112_v31  ;;  %v543_v36 = vsel %vm542_vm6, %v2116_v34, %v2117_v33 }
 0x16b   : > { %v554_v37 = vpack.c.bf16 %v531_v35, %v2353_v13  ;;  %v555_v38 = vpack.c.bf16 %v543_v36, %v543_v36 }
 0x16d   : > { %1967 = vmatpush3.bf16.msra.mxu1 %v554_v37  ;;  %v579_v39 = vsel %vm577_vm7, %v555_v38, 0  ;;  %v1866_v37 = vld [vmem:[%s2664_s8 + $0x4] sm:$0xf] }
 0x16e   : > { %1968 = vmatprep.subr.bf16.mxu1 %v2237_v0 }
 0x171   : > { %1969 = vmatpush3.bf16.msra.mxu1 %v579_v39 }
 0x172   : > { %1990 = vmatprep.subr.bf16.mxu1 %v2237_v0 }
 0x174   : > { %1971 = vmatmul.mubr.msk.bf16.vlgmr.msra.gmra.mrb[0].mxu1 %vm573_vm8, %v2219_v40 }
 0x175   : > { %1992 = vmatprep.mubr.msk.bf16.mxu1 %vm2238_vm0, %v2237_v0 }
 0x178   : > { %v561_v41 = vpop.permute.xlu1 %560  ;;  %v566_v45 = vpop.permute.xlu0 %565 }
 0x17c   : > { %v630_v53 = vpop.permute.xlu1 %629 }
 0x247   : > { %v615_v42 = vpop.f32.mrb[0].mxu1 }
 0x248   : > { %v616_v43 = vadd.f32 %v615_v42, %v561_v41  ;;  %v1972_v44 = vpop.f32.mrb[1].mxu1 }
 0x249   : > { %v618_v46 = vpop.f32.mrb[2].mxu1 }
 0x24a   : > { %v619_v47 = vadd.f32 %v618_v46, %v566_v45  ;;  %v1973_v48 = vpop.f32.mrb[3].mxu1  ;;  %v622_v49 = vmax.f32 %v616_v43, 0.0 }
 0x24b   : > { %v1872_v48 = vld [vmem:[%s2663_s7 + $0x28] sm:$0xff] }
 0x24c   : > { %v623_v50 = vmax.f32 %v619_v47, 0.0 }
 0x24e   : > { %v625_v51 = vpack.c.bf16 %v623_v50, %v622_v49  ;;  %v1871_v49 = vld [vmem:[%s2663_s7 + $0x20] sm:$0xff] }
 0x24f   : > { %v1047_v50 = vld [vmem:[%s2667_s11] sm:$0x3f] }
 0x250   : > { %1975 = vmatpush3.bf16.msra.mxu0 %v625_v51  ;;  %v1876_v51 = vld [vmem:[%s2665_s9 + $0x10] sm:$0xff] }
 0x251   : > { %1980 = vmatprep.subr.bf16.mxu0 %v2237_v0 }
 0x253   : > { %1977 = vmatmul.mubr.msk.bf16.vlgmr.msra.gmra.mrb[4].mxu0 %vm632_vm9, %v624_v52  ;;  %v1124_v52 = vld [vmem:[%s2661_s5] sm:$0xff] }
 0x254   : > { %1986 = vmatprep.mubr.msk.bf16.mxu0 %vm2238_vm0, %v2237_v0 }
 0x326   : > { %v670_v54 = vpop.f32.mrb[4].mxu0 }
 0x327   : > { %v671_v55 = vadd.f32 %v670_v54, %v630_v53  ;;  %v1978_v56 = vpop.f32.mrb[5].mxu0 }
 0x328   : > { %v673_v58 = vpop.f32.mrb[6].mxu0 }
 0x329   : > { %v676_v59 = vadd.f32 %v671_v55, %v2353_v13  ;;  %v1979_v60 = vpop.f32.mrb[7].mxu0 }
 0x32b   : > { %v2399_v61 = vmul.f32 %v2395_v57, %v676_v59 }
 0x32d   : > { %v2124_v62 = vpack.i.bf16 %v2399_v61, %v2237_v0  ;;  %v2134_v63 = vpack.i.bf16 %v2237_v0, %v2399_v61 }
 0x32f   : > { %2125 = vrot.lane.b32.xlu1 %v2124_v62, %s2241_s18  ;;  %2120 = vrot.lane.b32.xlu0 %v2124_v62, %s2244_s15 }
 0x333   : > { %2135 = vrot.lane.b32.xlu1 %v2134_v63, %s2245_s16  ;;  %2130 = vrot.lane.b32.xlu0 %v2134_v63, %s2243_s20 }
 0x337   : > { %751 = vperm.xlu1 %2118, %v1863_v1   ;;  %746 = vperm.xlu0 %2097, %v1862_v2  }
 0x33b   : > { %815 = vperm.xlu0 %2097, %v1867_v3  }
 0x3a1   : > { %v2126_v4 = vpop.permute.xlu1 %2125  ;;  %v2121_v5 = vpop.permute.xlu0 %2120 }
 0x3a2   : > { %v2128_v6 = vunpack.i.h.bf16 %v2126_v4  ;;  %v2127_v7 = vunpack.i.l.bf16 %v2126_v4  ;;  %v2123_v9 = vunpack.i.h.bf16 %v2121_v5  ;;  %v2122_v10 = vunpack.i.l.bf16 %v2121_v5 }
 0x3a4   : > { %v702_v11 = vsel %vm504_vm3, %v2127_v7, %v2128_v6  ;;  %v691_v12 = vsel %vm442_vm2, %v2122_v10, %v2123_v9 }
 0x3a5   : > { %v738_v13 = vpack.c.bf16 %v702_v11, %v691_v12  ;;  %v2136_v14 = vpop.permute.xlu1 %2135  ;;  %v2131_v15 = vpop.permute.xlu0 %2130  ;;  %v2221_v12 = vld [vmem:[%s2662_s6 + $0x10] sm:$0xff]  }
 0x3a6   : > { %v2138_v16 = vunpack.i.h.bf16 %v2136_v14  ;;  %v2137_v17 = vunpack.i.l.bf16 %v2136_v14  ;;  %v2133_v18 = vunpack.i.h.bf16 %v2131_v15  ;;  %v2132_v19 = vunpack.i.l.bf16 %v2131_v15 }
 0x3a7   : > { %1981 = vmatpush3.bf16.msra.mxu0 %v738_v13 }
 0x3a8   : > { %v715_v20 = vsel %vm542_vm6, %v2132_v19, %v2133_v18  ;;  %1982 = vmatprep.subr.bf16.mxu0 %v2237_v0  ;;  %v727_v21 = vsel %vm726_vm10, %v2137_v17, %v2138_v16 }
 0x3a9   : > { %v739_v22 = vpack.c.bf16 %v715_v20, %v2399_v61  ;;  %v740_v23 = vpack.c.bf16 %v727_v21, %v727_v21 }
 0x3ab   : > { %1983 = vmatpush3.bf16.msra.mxu0 %v739_v22  ;;  %v763_v24 = vsel %vm577_vm7, %v740_v23, 0 }
 0x3ac   : > { %1984 = vmatprep.subr.bf16.mxu0 %v2237_v0 }
 0x3af   : > { %1985 = vmatpush3.bf16.msra.mxu0 %v763_v24  ;;  %v1875_v24 = vld [vmem:[%s2664_s8 + $0x8] sm:$0xf] }
 0x3b0   : > { %2006 = vmatprep.subr.bf16.mxu0 %v2237_v0 }
 0x3b2   : > { %1987 = vmatmul.mubr.msk.bf16.vlgmr.msra.gmra.mrb[8].mxu0 %vm573_vm8, %v2220_v25 }
 0x3b3   : > { %2008 = vmatprep.mubr.msk.bf16.mxu0 %vm2238_vm0, %v2237_v0 }
 0x3b6   : > { %v747_v26 = vpop.permute.xlu0 %746  ;;  %v752_v30 = vpop.permute.xlu1 %751 }
 0x3ba   : > { %v816_v38 = vpop.permute.xlu0 %815 }
 0x485   : > { %v799_v27 = vpop.f32.mrb[8].mxu0 }
 0x486   : > { %v800_v28 = vadd.f32 %v799_v27, %v747_v26  ;;  %v1988_v29 = vpop.f32.mrb[9].mxu0 }
 0x487   : > { %v802_v31 = vpop.f32.mrb[10].mxu0 }
 0x488   : > { %v803_v32 = vadd.f32 %v802_v31, %v752_v30  ;;  %v1989_v33 = vpop.f32.mrb[11].mxu0  ;;  %v806_v34 = vmax.f32 %v800_v28, 0.0 }
 0x48a   : > { %v807_v35 = vmax.f32 %v803_v32, 0.0 }
 0x48c   : > { %v810_v36 = vpack.c.bf16 %v807_v35, %v806_v34  ;;  %v1045_v35 = vld [vmem:[%s2666_s10] sm:$0x7] }
 0x48e   : > { %1991 = vmatpush3.bf16.msra.mxu1 %v810_v36 }
 0x48f   : > { %1996 = vmatprep.subr.bf16.mxu1 %v2237_v0 }
 0x491   : > { %1993 = vmatmul.mubr.msk.bf16.vlgmr.msra.gmra.mrb[4].mxu1 %vm632_vm9, %v1866_v37 }
 0x492   : > { %2002 = vmatprep.mubr.msk.bf16.mxu1 %vm2238_vm0, %v2237_v0 }
 0x564   : > { %v855_v39 = vpop.f32.mrb[4].mxu1 }
 0x565   : > { %v856_v40 = vadd.f32 %v855_v39, %v816_v38  ;;  %v1994_v41 = vpop.f32.mrb[5].mxu1 }
 0x566   : > { %v858_v42 = vpop.f32.mrb[6].mxu1 }
 0x567   : > { %v861_v43 = vadd.f32 %v856_v40, %v2399_v61  ;;  %v1995_v44 = vpop.f32.mrb[7].mxu1 }
 0x569   : > { %v2442_v45 = vmul.f32 %v2395_v57, %v861_v43 }
 0x56b   : > { %v2144_v46 = vpack.i.bf16 %v2442_v45, %v2237_v0  ;;  %v2154_v47 = vpack.i.bf16 %v2237_v0, %v2442_v45 }
 0x56d   : > { %2145 = vrot.lane.b32.xlu0 %v2144_v46, %s2244_s15  ;;  %2140 = vrot.lane.b32.xlu1 %v2144_v46, %s2670_s23 }
 0x571   : > { %2155 = vrot.lane.b32.xlu0 %v2154_v47, %s2669_s24  ;;  %2150 = vrot.lane.b32.xlu1 %v2154_v47, %s2245_s16 }
 0x575   : > { %933 = vperm.xlu0 %2097, %v1872_v48   ;;  %928 = vperm.xlu1 %2118, %v1871_v49  }
 0x579   : > { %1050 = vperm.xlu0 %2097, %v1047_v50   ;;  %997 = vperm.xlu1 %2118, %v1876_v51  }
 0x57d   : > { %1127 = vperm.xlu1 %2118, %v1124_v52  }
 0x5df   : > { %v2146_v53 = vpop.permute.xlu0 %2145  ;;  %v2141_v54 = vpop.permute.xlu1 %2140 }
 0x5e0   : > { %v2148_v55 = vunpack.i.h.bf16 %v2146_v53  ;;  %v2147_v56 = vunpack.i.l.bf16 %v2146_v53  ;;  %v2143_v58 = vunpack.i.h.bf16 %v2141_v54  ;;  %v2142_v59 = vunpack.i.l.bf16 %v2141_v54 }
 0x5e2   : > { %v884_v60 = vsel %vm442_vm2, %v2147_v56, %v2148_v55  ;;  %v873_v61 = vsel %vm872_vm11, %v2142_v59, %v2143_v58 }
 0x5e3   : > { %v920_v62 = vpack.c.bf16 %v884_v60, %v873_v61  ;;  %v2156_v63 = vpop.permute.xlu0 %2155  ;;  %v2151_v1 = vpop.permute.xlu1 %2150 }
 0x5e4   : > { %v2158_v2 = vunpack.i.h.bf16 %v2156_v63  ;;  %v2157_v3 = vunpack.i.l.bf16 %v2156_v63  ;;  %v2153_v4 = vunpack.i.h.bf16 %v2151_v1  ;;  %v2152_v5 = vunpack.i.l.bf16 %v2151_v1 }
 0x5e5   : > { %1997 = vmatpush3.bf16.msra.mxu1 %v920_v62 }
 0x5e6   : > { %v897_v6 = vsel %vm726_vm10, %v2152_v5, %v2153_v4  ;;  %1998 = vmatprep.subr.bf16.mxu1 %v2237_v0  ;;  %v909_v7 = vsel %vm908_vm12, %v2157_v3, %v2158_v2  ;;  %v1122_v3 = vld [vmem:[%s2660_s4] sm:$0xf] }
 0x5e7   : > { %v921_v9 = vpack.c.bf16 %v897_v6, %v2442_v45  ;;  %v922_v10 = vpack.c.bf16 %v909_v7, %v909_v7 }
 0x5e9   : > { %1999 = vmatpush3.bf16.msra.mxu1 %v921_v9  ;;  %v945_v11 = vsel %vm577_vm7, %v922_v10, 0 }
 0x5ea   : > { %2000 = vmatprep.subr.bf16.mxu1 %v2237_v0 }
 0x5ed   : > { %2001 = vmatpush3.bf16.msra.mxu1 %v945_v11 }
 0x5ee   : > { %2018 = vmatprep.subr.bf16.mxu1 %v2237_v0 }
 0x5f0   : > { %2003 = vmatmul.mubr.msk.bf16.vlgmr.msra.gmra.mrb[8].mxu1 %vm573_vm8, %v2221_v12 }
 0x5f1   : > { %2020 = vmatprep.mubr.msk.bf16.mxu1 %vm2238_vm0, %v2237_v0 }
 0x5f4   : > { %v929_v13 = vpop.permute.xlu1 %928  ;;  %v934_v17 = vpop.permute.xlu0 %933 }
 0x5f8   : > { %v998_v25 = vpop.permute.xlu1 %997  ;;  %v1051_v36 = vpop.permute.xlu0 %1050 }
 0x5fc   : > { %v1128_v4 = vpop.permute.xlu1 %1127 }
 0x6c3   : > { %v981_v14 = vpop.f32.mrb[8].mxu1 }
 0x6c4   : > { %v982_v15 = vadd.f32 %v981_v14, %v929_v13  ;;  %v2004_v16 = vpop.f32.mrb[9].mxu1  ;;  %v1882_v14 = vld [vmem:[%s2663_s7 + $0x30] sm:$0xff] }
 0x6c5   : > { %v984_v18 = vpop.f32.mrb[10].mxu1 }
 0x6c6   : > { %v985_v19 = vadd.f32 %v984_v18, %v934_v17  ;;  %v2005_v20 = vpop.f32.mrb[11].mxu1  ;;  %v988_v21 = vmax.f32 %v982_v15, 0.0  ;;  %v1887_v15 = vld [vmem:[%s2665_s9 + $0x18] sm:$0xff] }
 0x6c8   : > { %v989_v22 = vmax.f32 %v985_v19, 0.0 }
 0x6ca   : > { %v992_v23 = vpack.c.bf16 %v989_v22, %v988_v21 }
 0x6cc   : > { %2007 = vmatpush3.bf16.msra.mxu0 %v992_v23 }
 0x6cd   : > { %2012 = vmatprep.subr.bf16.mxu0 %v2237_v0 }
 0x6cf   : > { %2009 = vmatmul.mubr.msk.bf16.vlgmr.msra.gmra.mrb[12].mxu0 %vm632_vm9, %v1875_v24 }
 0x6d0   : > { %2014 = vmatprep.mubr.msk.bf16.mxu0 %vm2238_vm0, %v2237_v0 }
 0x7a2   : > { %v1037_v26 = vpop.f32.mrb[12].mxu0 }
 0x7a3   : > { %v1038_v27 = vadd.f32 %v1037_v26, %v998_v25  ;;  %v2010_v28 = vpop.f32.mrb[13].mxu0 }
 0x7a4   : > { %v1040_v29 = vpop.f32.mrb[14].mxu0 }
 0x7a5   : > { %v1043_v30 = vadd.f32 %v1038_v27, %v2442_v45  ;;  %v2011_v31 = vpop.f32.mrb[15].mxu0 }
 0x7a7   : > { %v1044_v32 = vmul.f32 %v2395_v57, %v1043_v30 }
 0x7a9   : > { %v1046_v33 = vpack.c.bf16 %v1044_v32, %v1044_v32 }
 0x7ab   : > { %v1057_v34 = vsel %vm577_vm7, %v1046_v33, 0 }
 0x7ac   : > { %2013 = vmatpush3.bf16.msra.mxu0 %v1057_v34 }
 0x7ad   : > { %2024 = vmatprep.subr.bf16.mxu0 %v2237_v0 }
 0x7af   : > { %2015 = vmatmul.mubr.msk.bf16.vlgmr.msra.gmra.mrb[16].mxu0 %vm872_vm11, %v1045_v35 }
 0x7b0   : > { %2030 = vmatprep.mubr.msk.bf16.mxu0 %vm2238_vm0, %v2237_v0 }
 0x882   : > { %v1093_v37 = vpop.f32.mrb[16].mxu0 }
 0x883   : > { %v1094_v38 = vadd.f32 %v1093_v37, %v1051_v36  ;;  %v2016_v39 = vpop.f32.mrb[17].mxu0  ;;  %v2222_v36 = vld [vmem:[%s2662_s6 + $0x18] sm:$0xff]  }
 0x884   : > { %v1096_v40 = vpop.f32.mrb[18].mxu0 }
 0x885   : > { %v1099_v41 = vmul.f32 %v2395_v57, %v1094_v38  ;;  %v2017_v42 = vpop.f32.mrb[19].mxu0 }
 0x887   : > { %v1102_v43 = vsel %vm1101_vm13, %v1099_v41, -inf  ;;  %1100 = vst [vmem:[%s2503_s14] sm:$0x3f] %v1099_v41 }
 0x888   : > { %v1103_v44 = vrot.slane %v1102_v43, 4 }
 0x88a   : > { %v1104_v45 = vmax.f32 %v1102_v43, %v1103_v44 }
 0x88c   : > { %v1105_v46 = vrot.slane %v1104_v45, 2 }
 0x88e   : > { %v1106_v47 = vmax.f32 %v1104_v45, %v1105_v46 }
 0x890   : > { %v1107_v48 = vrot.slane %v1106_v47, 1 }
 0x892   : > { %v1108_v49 = vmax.f32 %v1106_v47, %v1107_v48  ;;  %v1886_v48 = vld [vmem:[%s2664_s8 + $0xc] sm:$0xf] }
 0x894   : > { %v1109_v50 = vsub.f32 %v1099_v41, %v1108_v49 }
 0x896   : > { %v1110_v51 = vmul.f32 1.442695, %v1109_v50 }
 0x898   : > { %2225 = vpow2.f32 %v1110_v51 }
 0x8a2   : > { %v2226_v52 = vpop.eup %2225 }
 0x8a3   : > { %v1112_v53 = vsel %vm1101_vm13, %v2226_v52, 0.0 }
 0x8a4   : > { %v1113_v54 = vrot.slane %v1112_v53, 4 }
 0x8a6   : > { %v1114_v55 = vadd.f32 %v1113_v54, %v1112_v53 }
 0x8a8   : > { %v1115_v56 = vrot.slane %v1114_v55, 2 }
 0x8aa   : > { %v1116_v58 = vadd.f32 %v1115_v56, %v1114_v55 }
 0x8ac   : > { %v1117_v59 = vrot.slane %v1116_v58, 1 }
 0x8ae   : > { %v1118_v60 = vadd.f32 %v1117_v59, %v1116_v58 }
 0x8b0   : > { %2227 = vrcp.f32 %v1118_v60  ;;  %v1892_v60 = vld [vmem:[%s2663_s7 + $0x48] sm:$0xff] }
 0x8ba   : > { %v2228_v61 = vpop.eup %2227 }
 0x8bb   : > { %v1120_v62 = vmul.f32 %v2228_v61, %v2226_v52  ;;  %v1891_v61 = vld [vmem:[%s2663_s7 + $0x40] sm:$0xff] }
 0x8bd   : > { %v1121_v63 = vmul.f32 %v2395_v57, %v1120_v62  ;;  %v1896_v62 = vld [vmem:[%s2665_s9 + $0x20] sm:$0xff] }
 0x8bf   : > { %v1123_v1 = vpack.c.bf16 %v1121_v63, %v1121_v63 }
 0x8c1   : > { %v1136_v2 = vsel %vm1134_vm14, %v1123_v1, 0 }
 0x8c2   : > { %2019 = vmatpush3.bf16.msra.mxu1 %v1136_v2 }
 0x8c3   : > { %2034 = vmatprep.subr.bf16.mxu1 %v2237_v0 }
 0x8c5   : > { %2021 = vmatmul.mubr.msk.bf16.vlgmr.msra.gmra.mrb[12].mxu1 %vm1130_vm15, %v1122_v3 }
 0x8c6   : > { %2036 = vmatprep.mubr.msk.bf16.mxu1 %vm2238_vm0, %v2237_v0 }
 0x998   : > { %v1172_v5 = vpop.f32.mrb[12].mxu1 }
 0x999   : > { %v1173_v6 = vadd.f32 %v1172_v5, %v1128_v4  ;;  %v2022_v7 = vpop.f32.mrb[13].mxu1 }
 0x99a   : > { %v1175_v9 = vpop.f32.mrb[14].mxu1 }
 0x99b   : > { %v2517_v10 = vmul.f32 %v2350_v8, %v1173_v6  ;;  %v2023_v11 = vpop.f32.mrb[15].mxu1  ;;  %v1883_v8 = vld [vmem:[%s2663_s7 + $0x38] sm:$0xff] }
 0x99d   : > { %v2164_v12 = vpack.i.bf16 %v2517_v10, %v2237_v0  ;;  %v2174_v13 = vpack.i.bf16 %v2237_v0, %v2517_v10 }
 0x99f   : > { %2165 = vrot.lane.b32.xlu1 %v2164_v12, %s2240_s17  ;;  %2160 = vrot.lane.b32.xlu0 %v2164_v12, %s2241_s18 }
 0x9a3   : > { %2175 = vrot.lane.b32.xlu1 %v2174_v13, %s2243_s20  ;;  %2170 = vrot.lane.b32.xlu0 %v2174_v13, %s2242_s19  ;;  %s2671_s19 = smov 8  }
 0x9a7   : > { %1247 = vperm.xlu1 %2118, %v1883_v8   ;;  %1242 = vperm.xlu0 %2097, %v1882_v14  }
 0x9ab   : > { %1311 = vperm.xlu0 %2097, %v1887_v15  }
 0xa11   : > { %v2166_v16 = vpop.permute.xlu1 %2165  ;;  %v2161_v17 = vpop.permute.xlu0 %2160 }
 0xa12   : > { %v2168_v18 = vunpack.i.h.bf16 %v2166_v16  ;;  %v2167_v19 = vunpack.i.l.bf16 %v2166_v16  ;;  %v2163_v20 = vunpack.i.h.bf16 %v2161_v17  ;;  %v2162_v21 = vunpack.i.l.bf16 %v2161_v17 }
 0xa14   : > { %v1199_v22 = vsel %vm516_vm4, %v2167_v19, %v2168_v18  ;;  %v1188_v23 = vsel %vm504_vm3, %v2162_v21, %v2163_v20  ;;  %v2223_v20 = vld [vmem:[%s2662_s6 + $0x20] sm:$0xff]  }
 0xa15   : > { %v1234_v24 = vpack.c.bf16 %v1199_v22, %v1188_v23  ;;  %v2176_v25 = vpop.permute.xlu1 %2175  ;;  %v2171_v26 = vpop.permute.xlu0 %2170 }
 0xa16   : > { %v2178_v27 = vunpack.i.h.bf16 %v2176_v25  ;;  %v2177_v28 = vunpack.i.l.bf16 %v2176_v25  ;;  %v2173_v29 = vunpack.i.h.bf16 %v2171_v26  ;;  %v2172_v30 = vunpack.i.l.bf16 %v2171_v26 }
 0xa17   : > { %2025 = vmatpush3.bf16.msra.mxu0 %v1234_v24 }
 0xa18   : > { %v1212_v31 = vsel %vm530_vm5, %v2172_v30, %v2173_v29  ;;  %2026 = vmatprep.subr.bf16.mxu0 %v2237_v0  ;;  %v1223_v32 = vsel %vm542_vm6, %v2177_v28, %v2178_v27 }
 0xa19   : > { %v1235_v33 = vpack.c.bf16 %v1212_v31, %v2517_v10  ;;  %v1236_v34 = vpack.c.bf16 %v1223_v32, %v1223_v32  ;;  %v1895_v32 = vld [vmem:[%s2664_s8 + $0x10] sm:$0xf] }
 0xa1b   : > { %2027 = vmatpush3.bf16.msra.mxu0 %v1235_v33  ;;  %v1259_v35 = vsel %vm577_vm7, %v1236_v34, 0 }
 0xa1c   : > { %2028 = vmatprep.subr.bf16.mxu0 %v2237_v0 }
 0xa1f   : > { %2029 = vmatpush3.bf16.msra.mxu0 %v1259_v35 }
 0xa20   : > { %2050 = vmatprep.subr.bf16.mxu0 %v2237_v0 }
 0xa22   : > { %2031 = vmatmul.mubr.msk.bf16.vlgmr.msra.gmra.mrb[20].mxu0 %vm573_vm8, %v2222_v36 }
 0xa23   : > { %2052 = vmatprep.mubr.msk.bf16.mxu0 %vm2238_vm0, %v2237_v0 }
 0xa26   : > { %v1243_v37 = vpop.permute.xlu0 %1242  ;;  %v1248_v41 = vpop.permute.xlu1 %1247 }
 0xa2a   : > { %v1312_v49 = vpop.permute.xlu0 %1311 }
 0xaf5   : > { %v1295_v38 = vpop.f32.mrb[20].mxu0 }
 0xaf6   : > { %v1296_v39 = vadd.f32 %v1295_v38, %v1243_v37  ;;  %v2032_v40 = vpop.f32.mrb[21].mxu0 }
 0xaf7   : > { %v1298_v42 = vpop.f32.mrb[22].mxu0 }
 0xaf8   : > { %v1299_v43 = vadd.f32 %v1298_v42, %v1248_v41  ;;  %v2033_v44 = vpop.f32.mrb[23].mxu0  ;;  %v1302_v45 = vmax.f32 %v1296_v39, 0.0 }
 0xaf9   : > { %v1900_v44 = vld [vmem:[%s2663_s7 + $0x50] sm:$0xff] }
 0xafa   : > { %v1303_v46 = vmax.f32 %v1299_v43, 0.0  ;;  %v1901_v43 = vld [vmem:[%s2663_s7 + $0x58] sm:$0xff] }
 0xafc   : > { %v1306_v47 = vpack.c.bf16 %v1303_v46, %v1302_v45  ;;  %v1908_v45 = vld [vmem:[%s2667_s11 + $0x8] sm:$0x3f] }
 0xafd   : > { %v1905_v46 = vld [vmem:[%s2665_s9 + $0x28] sm:$0xff] }
 0xafe   : > { %2035 = vmatpush3.bf16.msra.mxu1 %v1306_v47 }
 0xaff   : > { %2040 = vmatprep.subr.bf16.mxu1 %v2237_v0 }
 0xb01   : > { %2037 = vmatmul.mubr.msk.bf16.vlgmr.msra.gmra.mrb[16].mxu1 %vm632_vm9, %v1886_v48 }
 0xb02   : > { %2046 = vmatprep.mubr.msk.bf16.mxu1 %vm2238_vm0, %v2237_v0 }
 0xbd4   : > { %v1351_v50 = vpop.f32.mrb[16].mxu1 }
 0xbd5   : > { %v1352_v51 = vadd.f32 %v1351_v50, %v1312_v49  ;;  %v2038_v52 = vpop.f32.mrb[17].mxu1 }
 0xbd6   : > { %v1354_v53 = vpop.f32.mrb[18].mxu1 }
 0xbd7   : > { %v1357_v54 = vadd.f32 %v1352_v51, %v2517_v10  ;;  %v2039_v55 = vpop.f32.mrb[19].mxu1 }
 0xbd9   : > { %v2560_v56 = vmul.f32 %v2395_v57, %v1357_v54 }
 0xbdb   : > { %v2184_v58 = vpack.i.bf16 %v2560_v56, %v2237_v0  ;;  %v2194_v59 = vpack.i.bf16 %v2237_v0, %v2560_v56 }
 0xbdd   : > { %2185 = vrot.lane.b32.xlu0 %v2184_v58, %s2241_s18  ;;  %2180 = vrot.lane.b32.xlu1 %v2184_v58, %s2244_s15 }
 0xbe1   : > { %2195 = vrot.lane.b32.xlu0 %v2194_v59, %s2245_s16  ;;  %2190 = vrot.lane.b32.xlu1 %v2194_v59, %s2243_s20 }
 0xbe5   : > { %1427 = vperm.xlu0 %2097, %v1892_v60   ;;  %1422 = vperm.xlu1 %2118, %v1891_v61  }
 0xbe9   : > { %1491 = vperm.xlu1 %2118, %v1896_v62  }
 0xc4f   : > { %v2186_v63 = vpop.permute.xlu0 %2185  ;;  %v2181_v1 = vpop.permute.xlu1 %2180 }
 0xc50   : > { %v2188_v2 = vunpack.i.h.bf16 %v2186_v63  ;;  %v2187_v3 = vunpack.i.l.bf16 %v2186_v63  ;;  %v2183_v4 = vunpack.i.h.bf16 %v2181_v1  ;;  %v2182_v5 = vunpack.i.l.bf16 %v2181_v1 }
 0xc52   : > { %v1379_v6 = vsel %vm504_vm3, %v2187_v3, %v2188_v2  ;;  %v1368_v7 = vsel %vm442_vm2, %v2182_v5, %v2183_v4  ;;  %v2224_v5 = vld [vmem:[%s2662_s6 + $0x28] sm:$0xff]  }
 0xc53   : > { %v1414_v9 = vpack.c.bf16 %v1379_v6, %v1368_v7  ;;  %v2196_v10 = vpop.permute.xlu0 %2195  ;;  %v2191_v11 = vpop.permute.xlu1 %2190 }
 0xc54   : > { %v2198_v12 = vunpack.i.h.bf16 %v2196_v10  ;;  %v2197_v13 = vunpack.i.l.bf16 %v2196_v10  ;;  %v2193_v8 = vunpack.i.h.bf16 %v2191_v11  ;;  %v2192_v14 = vunpack.i.l.bf16 %v2191_v11 }
 0xc55   : > { %2041 = vmatpush3.bf16.msra.mxu1 %v1414_v9 }
 0xc56   : > { %v1392_v15 = vsel %vm542_vm6, %v2192_v14, %v2193_v8  ;;  %2042 = vmatprep.subr.bf16.mxu1 %v2237_v0  ;;  %v1403_v16 = vsel %vm726_vm10, %v2197_v13, %v2198_v12 }
 0xc57   : > { %v1415_v17 = vpack.c.bf16 %v1392_v15, %v2560_v56  ;;  %v1416_v18 = vpack.c.bf16 %v1403_v16, %v1403_v16 }
 0xc59   : > { %2043 = vmatpush3.bf16.msra.mxu1 %v1415_v17  ;;  %v1439_v19 = vsel %vm577_vm7, %v1416_v18, 0  ;;  %v1904_v17 = vld [vmem:[%s2664_s8 + $0x14] sm:$0xf] }
 0xc5a   : > { %2044 = vmatprep.subr.bf16.mxu1 %v2237_v0 }
 0xc5d   : > { %2045 = vmatpush3.bf16.msra.mxu1 %v1439_v19 }
 0xc5e   : > { %2066 = vmatprep.subr.bf16.mxu1 %v2237_v0 }
 0xc60   : > { %2047 = vmatmul.mubr.msk.bf16.vlgmr.msra.gmra.mrb[20].mxu1 %vm573_vm8, %v2223_v20 }
 0xc61   : > { %2068 = vmatprep.mubr.msk.bf16.mxu1 %vm2238_vm0, %v2237_v0 }
 0xc64   : > { %v1423_v21 = vpop.permute.xlu1 %1422  ;;  %v1428_v25 = vpop.permute.xlu0 %1427 }
 0xc68   : > { %v1492_v33 = vpop.permute.xlu1 %1491 }
 0xd33   : > { %v1475_v22 = vpop.f32.mrb[20].mxu1 }
 0xd34   : > { %v1476_v23 = vadd.f32 %v1475_v22, %v1423_v21  ;;  %v2048_v24 = vpop.f32.mrb[21].mxu1 }
 0xd35   : > { %v1478_v26 = vpop.f32.mrb[22].mxu1 }
 0xd36   : > { %v1479_v27 = vadd.f32 %v1478_v26, %v1428_v25  ;;  %v2049_v28 = vpop.f32.mrb[23].mxu1  ;;  %v1482_v29 = vmax.f32 %v1476_v23, 0.0 }
 0xd37   : > { %v1907_v28 = vld [vmem:[%s2666_s10 + $0x4] sm:$0x7] }
 0xd38   : > { %v1483_v30 = vmax.f32 %v1479_v27, 0.0 }
 0xd3a   : > { %v1486_v31 = vpack.c.bf16 %v1483_v30, %v1482_v29 }
 0xd3c   : > { %2051 = vmatpush3.bf16.msra.mxu0 %v1486_v31 }
 0xd3d   : > { %2056 = vmatprep.subr.bf16.mxu0 %v2237_v0 }
 0xd3f   : > { %2053 = vmatmul.mubr.msk.bf16.vlgmr.msra.gmra.mrb[24].mxu0 %vm632_vm9, %v1895_v32 }
 0xd40   : > { %2062 = vmatprep.mubr.msk.bf16.mxu0 %vm2238_vm0, %v2237_v0 }
 0xe12   : > { %v1531_v34 = vpop.f32.mrb[24].mxu0 }
 0xe13   : > { %v1532_v35 = vadd.f32 %v1531_v34, %v1492_v33  ;;  %v2054_v36 = vpop.f32.mrb[25].mxu0 }
 0xe14   : > { %v1534_v37 = vpop.f32.mrb[26].mxu0 }
 0xe15   : > { %v1537_v38 = vadd.f32 %v1532_v35, %v2560_v56  ;;  %v2055_v39 = vpop.f32.mrb[27].mxu0 }
 0xe17   : > { %v2603_v40 = vmul.f32 %v2395_v57, %v1537_v38 }
 0xe19   : > { %v2204_v41 = vpack.i.bf16 %v2603_v40, %v2237_v0  ;;  %v2214_v42 = vpack.i.bf16 %v2237_v0, %v2603_v40 }
 0xe1b   : > { %2205 = vrot.lane.b32.xlu1 %v2204_v41, %s2244_s15  ;;  %2200 = vrot.lane.b32.xlu0 %v2204_v41, %s2671_s19 }
 0xe1f   : > { %2215 = vrot.lane.b32.xlu1 %v2214_v42, %s2672_s29  ;;  %2210 = vrot.lane.b32.xlu0 %v2214_v42, %s2245_s16 }
 0xe23   : > { %1607 = vperm.xlu1 %2118, %v1901_v43   ;;  %1602 = vperm.xlu0 %2097, %v1900_v44  }
 0xe27   : > { %1726 = vperm.xlu1 %2118, %v1908_v45   ;;  %1671 = vperm.xlu0 %2097, %v1905_v46  }
 0xe8d   : > { %v2206_v47 = vpop.permute.xlu1 %2205  ;;  %v2201_v48 = vpop.permute.xlu0 %2200 }
 0xe8e   : > { %v2208_v49 = vunpack.i.h.bf16 %v2206_v47  ;;  %v2207_v50 = vunpack.i.l.bf16 %v2206_v47  ;;  %v2203_v51 = vunpack.i.h.bf16 %v2201_v48  ;;  %v2202_v52 = vunpack.i.l.bf16 %v2201_v48 }
 0xe90   : > { %v1559_v53 = vsel %vm442_vm2, %v2207_v50, %v2208_v49  ;;  %v1548_v54 = vsel %vm872_vm11, %v2202_v52, %v2203_v51 }
 0xe91   : > { %v1594_v55 = vpack.c.bf16 %v1559_v53, %v1548_v54  ;;  %v2216_v56 = vpop.permute.xlu1 %2215  ;;  %v2211_v58 = vpop.permute.xlu0 %2210 }
 0xe92   : > { %v2218_v59 = vunpack.i.h.bf16 %v2216_v56  ;;  %v2217_v60 = vunpack.i.l.bf16 %v2216_v56  ;;  %v2213_v61 = vunpack.i.h.bf16 %v2211_v58  ;;  %v2212_v62 = vunpack.i.l.bf16 %v2211_v58 }
 0xe93   : > { %2057 = vmatpush3.bf16.msra.mxu0 %v1594_v55 }
 0xe94   : > { %v1572_v63 = vsel %vm726_vm10, %v2212_v62, %v2213_v61  ;;  %2058 = vmatprep.subr.bf16.mxu0 %v2237_v0  ;;  %v1583_v1 = vsel %vm908_vm12, %v2217_v60, %v2218_v59 }
 0xe95   : > { %v1595_v2 = vpack.c.bf16 %v1572_v63, %v2603_v40  ;;  %v1596_v3 = vpack.c.bf16 %v1583_v1, %v1583_v1 }
 0xe97   : > { %2059 = vmatpush3.bf16.msra.mxu0 %v1595_v2  ;;  %v1619_v4 = vsel %vm577_vm7, %v1596_v3, 0 }
 0xe98   : > { %2060 = vmatprep.subr.bf16.mxu0 %v2237_v0 }
 0xe9b   : > { %2061 = vmatpush3.bf16.msra.mxu0 %v1619_v4 }
 0xe9e   : > { %2063 = vmatmul.mubr.msk.bf16.vlgmr.msra.gmra.mrb[28].mxu0 %vm573_vm8, %v2224_v5 }
 0xea2   : > { %v1603_v6 = vpop.permute.xlu0 %1602  ;;  %v1608_v11 = vpop.permute.xlu1 %1607 }
 0xea6   : > { %v1672_v18 = vpop.permute.xlu0 %1671 }
 0xf71   : > { %v1655_v7 = vpop.f32.mrb[28].mxu0 }
 0xf72   : > { %v1656_v9 = vadd.f32 %v1655_v7, %v1603_v6  ;;  %v2064_v10 = vpop.f32.mrb[29].mxu0 }
 0xf73   : > { %v1658_v12 = vpop.f32.mrb[30].mxu0 }
 0xf74   : > { %v1659_v13 = vadd.f32 %v1658_v12, %v1608_v11  ;;  %v2065_v8 = vpop.f32.mrb[31].mxu0  ;;  %v1662_v14 = vmax.f32 %v1656_v9, 0.0 }
 0xf76   : > { %v1663_v15 = vmax.f32 %v1659_v13, 0.0 }
 0xf78   : > { %v1666_v16 = vpack.c.bf16 %v1663_v15, %v1662_v14 }
 0xf7a   : > { %2067 = vmatpush3.bf16.msra.mxu1 %v1666_v16 }
 0xf7b   : > { %2072 = vmatprep.subr.bf16.mxu1 %v2237_v0 }
 0xf7d   : > { %2069 = vmatmul.mubr.msk.bf16.vlgmr.msra.gmra.mrb[24].mxu1 %vm632_vm9, %v1904_v17 }
 0xf7e   : > { %2074 = vmatprep.mubr.msk.bf16.mxu1 %vm2238_vm0, %v2237_v0  ;;  %v1727_v0 = vpop.permute.xlu1 %1726 }
0x1050   : > { %v1711_v19 = vpop.f32.mrb[24].mxu1 }
0x1051   : > { %v1712_v20 = vadd.f32 %v1711_v19, %v1672_v18  ;;  %v2070_v21 = vpop.f32.mrb[25].mxu1 }
0x1052   : > { %v1714_v22 = vpop.f32.mrb[26].mxu1 }
0x1053   : > { %v1717_v23 = vadd.f32 %v1712_v20, %v2603_v40  ;;  %v2071_v24 = vpop.f32.mrb[27].mxu1 }
0x1055   : > { %v1718_v25 = vmul.f32 %v2395_v57, %v1717_v23 }
0x1057   : > { %v1721_v26 = vpack.c.bf16 %v1718_v25, %v1718_v25 }
0x1059   : > { %v1733_v27 = vsel %vm577_vm7, %v1721_v26, 0 }
0x105a   : > { %2073 = vmatpush3.bf16.msra.mxu1 %v1733_v27 }
0x105d   : > { %2075 = vmatmul.mubr.msk.bf16.vlgmr.msra.gmra.mrb[28].mxu1 %vm872_vm11, %v1907_v28 }
0x1130   : > { %v1769_v29 = vpop.f32.mrb[28].mxu1 }
0x1131   : > { %v1770_v30 = vadd.f32 %v1769_v29, %v1727_v0  ;;  %v2076_v31 = vpop.f32.mrb[29].mxu1 }
0x1132   : > { %v1772_v32 = vpop.f32.mrb[30].mxu1 }
0x1133   : > { %v1775_v33 = vmul.f32 %v2395_v57, %v1770_v30  ;;  %v2077_v34 = vpop.f32.mrb[31].mxu1 }
0x1135   : > { %1910 = vst [vmem:[%s2503_s14 + $0x8] sm:$0x3f] %v1775_v33 }
0x1136 PF: > { %s22_s21 = sadd.s32 1, %s2235_s21  }
0x1137   : > { %p19_p4 = scmp.ge.s32.totalorder %s22_s21, 4  }
0x1139   :  { %21 = sbr.rel (!%p19_p4) target bundleno = 1 (0x1), region = 124 }

</bundles_post_ra>
